<compile_context>
chip_gen: v7x
topology: tpu7x:2x2x1
jax: 0.10.0
libtpu: 0.0.40
codegen_flags: <defaults>
</compile_context>

<pallas_src>
import functools

import jax
import jax.numpy as jnp
from jax import lax
from jax.experimental import pallas as pl
from jax.experimental.pallas import tpu as pltpu

LN_EPS = 1e-5                 # torch.nn.LayerNorm default eps
_INV_SQRT2 = 0.7071067811865476


# ----------------------------- kernel helpers -----------------------------

def _layernorm(x, g, b):
    mu = jnp.mean(x, axis=-1, keepdims=True)
    var = jnp.mean((x - mu) ** 2, axis=-1, keepdims=True)
    return (x - mu) * lax.rsqrt(var + LN_EPS) * g + b


def _gelu_exact(x):
    # torch.nn.GELU() default = exact erf formulation.
    # TODO(synk): on v5e, if VALU-bound, switch to the tanh (EUP) approximation.
    return 0.5 * x * (1.0 + lax.erf(x * _INV_SQRT2))


def _vmem_limit_bytes():
    """Per-generation scoped-VMEM limit (leave headroom below physical)."""
    try:
        cap = pltpu.get_tpu_info().vmem_capacity_bytes
        return int(min(cap - (16 << 20), 100 << 20))
    except Exception:
        return 64 << 20


# ----------------------------- Pallas kernels -----------------------------

def transformer_block_kernel(x_full_ref, x_q_ref,
                             ln1g_ref, ln1b_ref,
                             wq_ref, bq_ref, wkv_ref, bkv_ref,
                             wp_ref, bp_ref,
                             ln2g_ref, ln2b_ref,
                             w1_ref, b1_ref, w2_ref, b2_ref,
                             o_ref, *, num_heads, res_scale, q_tile):
    """One TransformerBlock for one (batch row, query tile); grid = (B, T/TQ)."""
    qi = pl.program_id(1)
    x_full = x_full_ref[0]                         # (T, E)  f32 -- full row (for K/V)
    x_q = x_q_ref[0]                               # (TQ, E) f32 -- this query tile
    T, E = x_full.shape
    TQ = q_tile
    H = num_heads
    Dh = E // H
    inv_sqrt_d = 1.0 / (Dh ** 0.5)

    # ---- Masked multi-head self-attention on ln1(x) ----
    g1 = ln1g_ref[0]
    be1 = ln1b_ref[0]
    xn_full = _layernorm(x_full, g1, be1).astype(jnp.bfloat16)     # (T, E)
    xn_q = _layernorm(x_q, g1, be1).astype(jnp.bfloat16)           # (TQ, E)

    # Fused, lane-dense K/V projection (N = 2E) over the whole row; Q only for this tile.
    kv = jnp.dot(xn_full, wkv_ref[...],
                 preferred_element_type=jnp.float32) + bkv_ref[0]  # (T, 2E) f32
    q = jnp.dot(xn_q, wq_ref[...],
                preferred_element_type=jnp.float32) + bq_ref[0]    # (TQ, E) f32

    # Fold 1/sqrt(Dh) into Q (T*Dh multiply instead of T*T on the scores).
    q_bf = (q * inv_sqrt_d).astype(jnp.bfloat16)
    k_bf = kv[:, :E].astype(jnp.bfloat16)
    v_bf = kv[:, E:].astype(jnp.bfloat16)

    row = lax.broadcasted_iota(jnp.int32, (TQ, T), 0) + qi * TQ
    col = lax.broadcasted_iota(jnp.int32, (TQ, T), 1)
    causal = row >= col                                            # (TQ, T)
    # TODO(synk): padding_mask branch of MaskedSelfAttention not implemented (None path).

    # Per-head attention with the head reduction folded into the final projection:
    # concat(heads) @ Wp (no (H,T,E) intermediate, no sum over a head axis).
    head_outs = []
    for h in range(H):                             # H is static -> unrolled at trace time
        sl = slice(h * Dh, (h + 1) * Dh)
        s = lax.dot_general(q_bf[:, sl], k_bf[:, sl],
                            dimension_numbers=(((1,), (1,)), ((), ())),
                            preferred_element_type=jnp.float32)    # (TQ, T)
        s = jnp.where(causal, s, -1e9)             # masked_fill(~mask, -1e9)
        s = s - jnp.max(s, axis=-1, keepdims=True)
        p = jnp.exp(s)
        p = p * pl.reciprocal(jnp.sum(p, axis=-1, keepdims=True), approx=True)
        head_outs.append(jnp.dot(p.astype(jnp.bfloat16), v_bf[:, sl],
                                 preferred_element_type=jnp.float32))   # (TQ, Dh)
    concat = jnp.concatenate(head_outs, axis=-1)                   # (TQ, E) f32
    attn = jnp.dot(concat.astype(jnp.bfloat16), wp_ref[...],
                   preferred_element_type=jnp.float32) + bp_ref[0]
    # TODO(synk): nn.Dropout is identity in eval mode; training-mode dropout not implemented.
    xq = x_q + res_scale * attn

    # ---- FeedForward on ln2(x) ----
    xn2 = _layernorm(xq, ln2g_ref[0], ln2b_ref[0])
    h1 = jnp.dot(xn2.astype(jnp.bfloat16), w1_ref[...],
                 preferred_element_type=jnp.float32) + b1_ref[0]
    h1 = _gelu_exact(h1)
    ff = jnp.dot(h1.astype(jnp.bfloat16), w2_ref[...],
                 preferred_element_type=jnp.float32) + b2_ref[0]
    o_ref[0] = xq + res_scale * ff


def lm_head_kernel(x_ref, w_ref, b_ref, o_ref):
    """logits tile = x_bf16 @ embT_tile + b_tile (plain (T,E)@(E,TV) contraction)."""
    o_ref[0] = jnp.dot(x_ref[0], w_ref[...],
                       preferred_element_type=jnp.float32) + b_ref[0]


# ----------------------------- wrappers -----------------------------

def transformer_block_pallas(x, p, *, num_heads, res_scale, vmem_limit):
    B, T, E = x.shape
    TQ = 128 if T % 128 == 0 else T                 # query tile (full T for tiny configs)
    n_q = T // TQ

    args = [p["ln1_g"], p["ln1_b"],
            p["wq"], p["bq"], p["wkv"], p["bkv"],
            p["wp"], p["bp"],
            p["ln2_g"], p["ln2_b"],
            p["w1"], p["b1"], p["w2"], p["b2"]]
    # Full-array (resident) specs for weights; index map ignores the grid position.
    # TODO(synk): for E >~ 1280 on v7x, tile FFN weights over the 4E hidden dim instead.
    full_specs = [pl.BlockSpec(a.shape, lambda b, q, _nd=a.ndim: (0,) * _nd)
                  for a in args]

    kern = functools.partial(transformer_block_kernel,
                             num_heads=num_heads, res_scale=res_scale, q_tile=TQ)
    return pl.pallas_call(
        kern,
        out_shape=jax.ShapeDtypeStruct((B, T, E), jnp.float32),
        grid=(B, n_q),
        in_specs=[pl.BlockSpec((1, T, E), lambda b, q: (b, 0, 0)),   # full row (K/V)
                  pl.BlockSpec((1, TQ, E), lambda b, q: (b, q, 0))]  # query tile
                 + full_specs,
        out_specs=pl.BlockSpec((1, TQ, E), lambda b, q: (b, q, 0)),
        compiler_params=pltpu.CompilerParams(
            dimension_semantics=("parallel", "parallel"),
            vmem_limit_bytes=vmem_limit),
    )(x, x, *args)


def lm_head_pallas(x, head_w, head_b, vocab, *, vmem_limit):
    """Tied-embedding LM head; embedding pre-transposed/padded to (E, Vpad) bf16."""
    B, T, E = x.shape
    Vpad = head_w.shape[1]
    TV = Vpad
    for cand in (4096, 2048, 1024, 512, 256, 128):  # Vpad is always a multiple of 256
        if Vpad % cand == 0:
            TV = cand
            break
    x_bf = x.astype(jnp.bfloat16)                   # cast once, not per vocab tile
    logits = pl.pallas_call(
        lm_head_kernel,
        out_shape=jax.ShapeDtypeStruct((B, T, Vpad), jnp.float32),
        grid=(B, Vpad // TV),
        in_specs=[pl.BlockSpec((1, T, E), lambda b, j: (b, 0, 0)),
                  pl.BlockSpec((E, TV), lambda b, j: (0, j)),
                  pl.BlockSpec((1, TV), lambda b, j: (0, j))],
        out_specs=pl.BlockSpec((1, T, TV), lambda b, j: (b, 0, j)),
        compiler_params=pltpu.CompilerParams(
            dimension_semantics=("parallel", "parallel"),
            vmem_limit_bytes=vmem_limit),
    )(x_bf, head_w, head_b)
    return logits[:, :, :vocab]


def prepare_params(raw):
    """One-time kernel-ready parameter materialization (hoisted out of the forward)."""
    bf = jnp.bfloat16
    V, E = raw["emb"].shape
    Vpad = ((V + 255) // 256) * 256                  # lane/MXU-friendly padded vocab
    emb_t = raw["emb"].T.astype(bf)                  # (E, V) -- MXU-native RHS layout
    head_b = raw["rev_b"]
    if Vpad != V:
        emb_t = jnp.pad(emb_t, ((0, 0), (0, Vpad - V)))
        head_b = jnp.pad(head_b, ((0, 0), (0, Vpad - V)))
    prep = {"emb": raw["emb"], "pos": raw["pos"],
            "head_w": emb_t, "head_b": head_b, "vocab": V, "blocks": []}
    for p in raw["blocks"]:
        prep["blocks"].append({
            "ln1_g": p["ln1_g"], "ln1_b": p["ln1_b"],
            "wq": p["wq"].astype(bf), "bq": p["bq"],
            "wkv": jnp.concatenate([p["wk"], p["wv"]], axis=1).astype(bf),  # (E, 2E)
            "bkv": jnp.concatenate([p["bk"], p["bv"]], axis=1),             # (1, 2E)
            "wp": p["wp"].astype(bf), "bp": p["bp"],
            "ln2_g": p["ln2_g"], "ln2_b": p["ln2_b"],
            "w1": p["w1"].astype(bf), "b1": p["b1"],
            "w2": p["w2"].astype(bf), "b2": p["b2"],
        })
    return prep


def gpt_forward(tokens, prep, *, num_heads, num_layers):
    """Full GPT forward. tokens: int32 (B, T) with T == context_len."""
    x = prep["emb"][tokens] + prep["pos"][None, :, :]   # embedding + positional (JAX glue)
    res_scale = 1.0 / (num_layers ** 0.5)
    vmem_limit = _vmem_limit_bytes()
    # TODO(synk): cross-pallas_call prefetch of next-layer weights (P10) not implemented.
    for blk in prep["blocks"]:
        x = transformer_block_pallas(x, blk, num_heads=num_heads,
                                     res_scale=res_scale, vmem_limit=vmem_limit)
    return lm_head_pallas(x, prep["head_w"], prep["head_b"], prep["vocab"],
                          vmem_limit=vmem_limit)


# ----------------------------- pure-JAX reference -----------------------------

def _ln_ref(x, g, b):
    mu = x.mean(-1, keepdims=True)
    var = ((x - mu) ** 2).mean(-1, keepdims=True)
    return (x - mu) / jnp.sqrt(var + LN_EPS) * g + b


def _block_ref(x, p, num_heads, res_scale):
    B, T, E = x.shape
    Dh = E // num_heads
    xn = _ln_ref(x, p["ln1_g"][0], p["ln1_b"][0])
    q = xn @ p["wq"] + p["bq"][0]
    k = xn @ p["wk"] + p["bk"][0]
    v = xn @ p["wv"] + p["bv"][0]
    q = q.reshape(B, T, num_heads, Dh).transpose(0, 2, 1, 3)
    k = k.reshape(B, T, num_heads, Dh).transpose(0, 2, 1, 3)
    v = v.reshape(B, T, num_heads, Dh).transpose(0, 2, 1, 3)
    s = jnp.einsum('bhtd,bhsd->bhts', q, k) / (Dh ** 0.5)
    causal = jnp.tril(jnp.ones((T, T), bool))
    s = jnp.where(causal, s, -1e9)
    a = jax.nn.softmax(s, axis=-1)
    o = jnp.einsum('bhts,bhsd->bhtd', a, v).transpose(0, 2, 1, 3).reshape(B, T, E)
    o = o @ p["wp"] + p["bp"][0]
    x = x + res_scale * o
    xn2 = _ln_ref(x, p["ln2_g"][0], p["ln2_b"][0])
    h = jax.nn.gelu(xn2 @ p["w1"] + p["b1"][0], approximate=False)
    x = x + res_scale * (h @ p["w2"] + p["b2"][0])
    return x


def gpt_forward_ref(tokens, params, *, num_heads, num_layers):
    emb, pos = params["emb"], params["pos"]
    x = emb[tokens] + pos[None, :, :]
    res_scale = 1.0 / (num_layers ** 0.5)
    for blk in params["blocks"]:
        x = _block_ref(x, blk, num_heads, res_scale)
    return x @ emb.T + params["rev_b"][0]


# ----------------------------- params -----------------------------

def init_params(key, *, vocab_size, context_len, embed_dim, num_layers):
    E = embed_dim
    keys = jax.random.split(key, 3 + num_layers)

    def nrm(k, shape, scale=0.02):
        return (scale * jax.random.normal(k, shape)).astype(jnp.float32)

    params = {
        "emb": nrm(keys[0], (vocab_size, E), 0.1),
        "pos": nrm(keys[1], (context_len, E), 0.1),
        "rev_b": nrm(keys[2], (1, vocab_size), 0.02),
        "blocks": [],
    }
    for i in range(num_layers):
        ks = jax.random.split(keys[3 + i], 12)
        blk = {
            "ln1_g": jnp.ones((1, E), jnp.float32),
            "ln1_b": jnp.zeros((1, E), jnp.float32),
            "wq": nrm(ks[0], (E, E)), "bq": nrm(ks[1], (1, E)),
            "wk": nrm(ks[2], (E, E)), "bk": nrm(ks[3], (1, E)),
            "wv": nrm(ks[4], (E, E)), "bv": nrm(ks[5], (1, E)),
            "wp": nrm(ks[6], (E, E)), "bp": nrm(ks[7], (1, E)),
            "ln2_g": jnp.ones((1, E), jnp.float32),
            "ln2_b": jnp.zeros((1, E), jnp.float32),
            "w1": nrm(ks[8], (E, 4 * E)), "b1": nrm(ks[9], (1, 4 * E)),
            "w2": nrm(ks[10], (4 * E, E)), "b2": nrm(ks[11], (1, E)),
        }
        params["blocks"].append(blk)
    return params


# ----------------------------- main -----------------------------

if __name__ == "__main__":
    # Small config consistent with the module: embed_dim=32, vocab=64,
    # context_len=8, num_heads=4, num_layers=2, dropout=0.0 (eval).
    B, CTX, E, H, L, V = 2, 8, 32, 4, 2, 64

    key = jax.random.PRNGKey(0)
    k_param, k_tok = jax.random.split(key)
    raw_params = init_params(k_param, vocab_size=V, context_len=CTX,
                             embed_dim=E, num_layers=L)
    prepared = prepare_params(raw_params)      # one-time weight cast/fuse/transpose
    tokens = jax.random.randint(k_tok, (B, CTX), 0, V, dtype=jnp.int32)

    logits = gpt_forward(tokens, prepared, num_heads=H, num_layers=L)
    logits = jax.block_until_ready(logits)
    assert logits.shape == (B, CTX, V) and logits.dtype == jnp.float32

    ref = jax.block_until_ready(
        gpt_forward_ref(tokens, raw_params, num_heads=H, num_layers=L))
    # bf16 MXU inputs (f32 accumulation) => slightly looser tolerance than pure-f32.
    assert jnp.allclose(logits, ref, atol=2e-2, rtol=2e-2), (
        float(jnp.max(jnp.abs(logits - ref))))

    print("KERNEL_OK")
</pallas_src>

<mosaic_0001>
module attributes {stable_mosaic.version = 11 : i64} {
  func.func @transformer_block_kernel(%arg0: i32, %arg1: i32, %arg2: memref<1x8x32xf32, #tpu.memory_space<vmem>>, %arg3: memref<1x8x32xf32, #tpu.memory_space<vmem>>, %arg4: memref<1x32xf32, #tpu.memory_space<vmem>>, %arg5: memref<1x32xf32, #tpu.memory_space<vmem>>, %arg6: memref<32x32xbf16, #tpu.memory_space<vmem>>, %arg7: memref<1x32xf32, #tpu.memory_space<vmem>>, %arg8: memref<32x64xbf16, #tpu.memory_space<vmem>>, %arg9: memref<1x64xf32, #tpu.memory_space<vmem>>, %arg10: memref<32x32xbf16, #tpu.memory_space<vmem>>, %arg11: memref<1x32xf32, #tpu.memory_space<vmem>>, %arg12: memref<1x32xf32, #tpu.memory_space<vmem>>, %arg13: memref<1x32xf32, #tpu.memory_space<vmem>>, %arg14: memref<32x128xbf16, #tpu.memory_space<vmem>>, %arg15: memref<1x128xf32, #tpu.memory_space<vmem>>, %arg16: memref<128x32xbf16, #tpu.memory_space<vmem>>, %arg17: memref<1x32xf32, #tpu.memory_space<vmem>>, %arg18: memref<1x8x32xf32, #tpu.memory_space<vmem>>) attributes {dimension_semantics = [#tpu.dimension_semantics<parallel>, #tpu.dimension_semantics<parallel>], iteration_bounds = array<i64: 2, 1>, scalar_prefetch = 0 : i64, scratch_operands = 0 : i64, tpu.core_type = #tpu.core_type<tc>, window_params = [{transform_indices = @transform_0, window_bounds = array<i64: 1, 8, 32>}, {transform_indices = @transform_1, window_bounds = array<i64: 1, 8, 32>}, {pipeline_mode = #tpu.pipeline_mode<synchronous>, transform_indices = @transform_2, window_bounds = array<i64: 1, 32>}, {pipeline_mode = #tpu.pipeline_mode<synchronous>, transform_indices = @transform_3, window_bounds = array<i64: 1, 32>}, {pipeline_mode = #tpu.pipeline_mode<synchronous>, transform_indices = @transform_4, window_bounds = array<i64: 32, 32>}, {pipeline_mode = #tpu.pipeline_mode<synchronous>, transform_indices = @transform_5, window_bounds = array<i64: 1, 32>}, {pipeline_mode = #tpu.pipeline_mode<synchronous>, transform_indices = @transform_6, window_bounds = array<i64: 32, 64>}, {pipeline_mode = #tpu.pipeline_mode<synchronous>, transform_indices = @transform_7, window_bounds = array<i64: 1, 64>}, {pipeline_mode = #tpu.pipeline_mode<synchronous>, transform_indices = @transform_8, window_bounds = array<i64: 32, 32>}, {pipeline_mode = #tpu.pipeline_mode<synchronous>, transform_indices = @transform_9, window_bounds = array<i64: 1, 32>}, {pipeline_mode = #tpu.pipeline_mode<synchronous>, transform_indices = @transform_10, window_bounds = array<i64: 1, 32>}, {pipeline_mode = #tpu.pipeline_mode<synchronous>, transform_indices = @transform_11, window_bounds = array<i64: 1, 32>}, {pipeline_mode = #tpu.pipeline_mode<synchronous>, transform_indices = @transform_12, window_bounds = array<i64: 32, 128>}, {pipeline_mode = #tpu.pipeline_mode<synchronous>, transform_indices = @transform_13, window_bounds = array<i64: 1, 128>}, {pipeline_mode = #tpu.pipeline_mode<synchronous>, transform_indices = @transform_14, window_bounds = array<i64: 128, 32>}, {pipeline_mode = #tpu.pipeline_mode<synchronous>, transform_indices = @transform_15, window_bounds = array<i64: 1, 32>}, {transform_indices = @transform_16, window_bounds = array<i64: 1, 8, 32>}]} {
    %c0 = arith.constant 0 : index
    %c0_0 = arith.constant 0 : index
    %c0_1 = arith.constant 0 : index
    %0 = vector.load %arg2[%c0, %c0_0, %c0_1] : memref<1x8x32xf32, #tpu.memory_space<vmem>>, vector<1x8x32xf32>
    %1 = vector.shape_cast %0 : vector<1x8x32xf32> to vector<8x32xf32>
    %c0_2 = arith.constant 0 : index
    %c0_3 = arith.constant 0 : index
    %c0_4 = arith.constant 0 : index
    %2 = vector.load %arg3[%c0_2, %c0_3, %c0_4] : memref<1x8x32xf32, #tpu.memory_space<vmem>>, vector<1x8x32xf32>
    %3 = vector.shape_cast %2 : vector<1x8x32xf32> to vector<8x32xf32>
    %c0_5 = arith.constant 0 : index
    %c0_6 = arith.constant 0 : index
    %4 = vector.load %arg4[%c0_5, %c0_6] : memref<1x32xf32, #tpu.memory_space<vmem>>, vector<1x32xf32>
    %5 = vector.shape_cast %4 : vector<1x32xf32> to vector<32xf32>
    %c0_7 = arith.constant 0 : index
    %c0_8 = arith.constant 0 : index
    %6 = vector.load %arg5[%c0_7, %c0_8] : memref<1x32xf32, #tpu.memory_space<vmem>>, vector<1x32xf32>
    %7 = vector.shape_cast %6 : vector<1x32xf32> to vector<32xf32>
    %cst = arith.constant dense<0.000000e+00> : vector<8xf32>
    %8 = vector.multi_reduction <add>, %1, %cst [1] : vector<8x32xf32> to vector<8xf32>
    %9 = vector.shape_cast %8 : vector<8xf32> to vector<8x1xf32>
    %cst_9 = arith.constant 3.200000e+01 : f32
    %10 = vector.broadcast %cst_9 : f32 to vector<8x1xf32>
    %11 = arith.divf %9, %10 : vector<8x1xf32>
    %12 = vector.broadcast %11 : vector<8x1xf32> to vector<8x32xf32>
    %13 = arith.subf %1, %12 : vector<8x32xf32>
    %14 = arith.mulf %13, %13 : vector<8x32xf32>
    %cst_10 = arith.constant dense<0.000000e+00> : vector<8xf32>
    %15 = vector.multi_reduction <add>, %14, %cst_10 [1] : vector<8x32xf32> to vector<8xf32>
    %16 = vector.shape_cast %15 : vector<8xf32> to vector<8x1xf32>
    %cst_11 = arith.constant 3.200000e+01 : f32
    %17 = vector.broadcast %cst_11 : f32 to vector<8x1xf32>
    %18 = arith.divf %16, %17 : vector<8x1xf32>
    %19 = vector.broadcast %11 : vector<8x1xf32> to vector<8x32xf32>
    %20 = arith.subf %1, %19 : vector<8x32xf32>
    %cst_12 = arith.constant 9.99999974E-6 : f32
    %21 = vector.broadcast %cst_12 : f32 to vector<8x1xf32>
    %22 = arith.addf %18, %21 : vector<8x1xf32>
    %23 = math.rsqrt %22 : vector<8x1xf32>
    %24 = vector.broadcast %23 : vector<8x1xf32> to vector<8x32xf32>
    %25 = arith.mulf %20, %24 : vector<8x32xf32>
    %26 = vector.shape_cast %5 : vector<32xf32> to vector<1x32xf32>
    %27 = vector.broadcast %26 : vector<1x32xf32> to vector<8x32xf32>
    %28 = arith.mulf %25, %27 : vector<8x32xf32>
    %29 = vector.shape_cast %7 : vector<32xf32> to vector<1x32xf32>
    %30 = vector.broadcast %29 : vector<1x32xf32> to vector<8x32xf32>
    %31 = arith.addf %28, %30 : vector<8x32xf32>
    %32 = arith.truncf %31 : vector<8x32xf32> to vector<8x32xbf16>
    %cst_13 = arith.constant dense<0.000000e+00> : vector<8xf32>
    %33 = vector.multi_reduction <add>, %3, %cst_13 [1] : vector<8x32xf32> to vector<8xf32>
    %34 = vector.shape_cast %33 : vector<8xf32> to vector<8x1xf32>
    %cst_14 = arith.constant 3.200000e+01 : f32
    %35 = vector.broadcast %cst_14 : f32 to vector<8x1xf32>
    %36 = arith.divf %34, %35 : vector<8x1xf32>
    %37 = vector.broadcast %36 : vector<8x1xf32> to vector<8x32xf32>
    %38 = arith.subf %3, %37 : vector<8x32xf32>
    %39 = arith.mulf %38, %38 : vector<8x32xf32>
    %cst_15 = arith.constant dense<0.000000e+00> : vector<8xf32>
    %40 = vector.multi_reduction <add>, %39, %cst_15 [1] : vector<8x32xf32> to vector<8xf32>
    %41 = vector.shape_cast %40 : vector<8xf32> to vector<8x1xf32>
    %cst_16 = arith.constant 3.200000e+01 : f32
    %42 = vector.broadcast %cst_16 : f32 to vector<8x1xf32>
    %43 = arith.divf %41, %42 : vector<8x1xf32>
    %44 = vector.broadcast %36 : vector<8x1xf32> to vector<8x32xf32>
    %45 = arith.subf %3, %44 : vector<8x32xf32>
    %cst_17 = arith.constant 9.99999974E-6 : f32
    %46 = vector.broadcast %cst_17 : f32 to vector<8x1xf32>
    %47 = arith.addf %43, %46 : vector<8x1xf32>
    %48 = math.rsqrt %47 : vector<8x1xf32>
    %49 = vector.broadcast %48 : vector<8x1xf32> to vector<8x32xf32>
    %50 = arith.mulf %45, %49 : vector<8x32xf32>
    %51 = vector.shape_cast %5 : vector<32xf32> to vector<1x32xf32>
    %52 = vector.broadcast %51 : vector<1x32xf32> to vector<8x32xf32>
    %53 = arith.mulf %50, %52 : vector<8x32xf32>
    %54 = vector.shape_cast %7 : vector<32xf32> to vector<1x32xf32>
    %55 = vector.broadcast %54 : vector<1x32xf32> to vector<8x32xf32>
    %56 = arith.addf %53, %55 : vector<8x32xf32>
    %57 = arith.truncf %56 : vector<8x32xf32> to vector<8x32xbf16>
    %c0_18 = arith.constant 0 : index
    %c0_19 = arith.constant 0 : index
    %58 = vector.load %arg8[%c0_18, %c0_19] : memref<32x64xbf16, #tpu.memory_space<vmem>>, vector<32x64xbf16>
    %cst_20 = arith.constant dense<0.000000e+00> : vector<8x64xf32>
    %59 = tpu.matmul %32, %58, %cst_20 {dimension_numbers = #tpu.dot_dimension_numbers<[1], [0], [0], [1], [0, 0, 1, 1], [], []>} : vector<8x32xbf16>, vector<32x64xbf16>, vector<8x64xf32> -> vector<8x64xf32>
    %c0_21 = arith.constant 0 : index
    %c0_22 = arith.constant 0 : index
    %60 = vector.load %arg9[%c0_21, %c0_22] : memref<1x64xf32, #tpu.memory_space<vmem>>, vector<1x64xf32>
    %61 = vector.shape_cast %60 : vector<1x64xf32> to vector<64xf32>
    %62 = vector.shape_cast %61 : vector<64xf32> to vector<1x64xf32>
    %63 = vector.broadcast %62 : vector<1x64xf32> to vector<8x64xf32>
    %64 = arith.addf %59, %63 : vector<8x64xf32>
    %c0_23 = arith.constant 0 : index
    %c0_24 = arith.constant 0 : index
    %65 = vector.load %arg6[%c0_23, %c0_24] : memref<32x32xbf16, #tpu.memory_space<vmem>>, vector<32x32xbf16>
    %cst_25 = arith.constant dense<0.000000e+00> : vector<8x32xf32>
    %66 = tpu.matmul %57, %65, %cst_25 {dimension_numbers = #tpu.dot_dimension_numbers<[1], [0], [0], [1], [0, 0, 1, 1], [], []>} : vector<8x32xbf16>, vector<32x32xbf16>, vector<8x32xf32> -> vector<8x32xf32>
    %c0_26 = arith.constant 0 : index
    %c0_27 = arith.constant 0 : index
    %67 = vector.load %arg7[%c0_26, %c0_27] : memref<1x32xf32, #tpu.memory_space<vmem>>, vector<1x32xf32>
    %68 = vector.shape_cast %67 : vector<1x32xf32> to vector<32xf32>
    %69 = vector.shape_cast %68 : vector<32xf32> to vector<1x32xf32>
    %70 = vector.broadcast %69 : vector<1x32xf32> to vector<8x32xf32>
    %71 = arith.addf %66, %70 : vector<8x32xf32>
    %cst_28 = arith.constant 0.353553385 : f32
    %72 = vector.broadcast %cst_28 : f32 to vector<8x32xf32>
    %73 = arith.mulf %71, %72 : vector<8x32xf32>
    %74 = arith.truncf %73 : vector<8x32xf32> to vector<8x32xbf16>
    %75 = vector.extract_strided_slice %64 {offsets = [0, 0], sizes = [8, 32], strides = [1, 1]} : vector<8x64xf32> to vector<8x32xf32>
    %76 = arith.truncf %75 : vector<8x32xf32> to vector<8x32xbf16>
    %77 = vector.extract_strided_slice %64 {offsets = [0, 32], sizes = [8, 32], strides = [1, 1]} : vector<8x64xf32> to vector<8x32xf32>
    %78 = arith.truncf %77 : vector<8x32xf32> to vector<8x32xbf16>
    %79 = tpu.iota {dimensions = array<i32: 0>} : vector<8x8xi32>
    %c8_i32 = arith.constant 8 : i32
    %80 = arith.muli %arg1, %c8_i32 : i32
    %81 = vector.broadcast %80 : i32 to vector<8x8xi32>
    %82 = arith.addi %79, %81 : vector<8x8xi32>
    %83 = tpu.iota {dimensions = array<i32: 1>} : vector<8x8xi32>
    %84 = arith.cmpi sge, %82, %83 : vector<8x8xi32>
    %85 = vector.extract_strided_slice %74 {offsets = [0, 0], sizes = [8, 8], strides = [1, 1]} : vector<8x32xbf16> to vector<8x8xbf16>
    %86 = vector.extract_strided_slice %76 {offsets = [0, 0], sizes = [8, 8], strides = [1, 1]} : vector<8x32xbf16> to vector<8x8xbf16>
    %cst_29 = arith.constant dense<0.000000e+00> : vector<8x8xf32>
    %87 = tpu.matmul %85, %86, %cst_29 {dimension_numbers = #tpu.dot_dimension_numbers<[1], [1], [0], [0], [0, 0, 1, 0], [], []>} : vector<8x8xbf16>, vector<8x8xbf16>, vector<8x8xf32> -> vector<8x8xf32>
    %cst_30 = arith.constant -1.000000e+09 : f32
    %88 = vector.broadcast %cst_30 : f32 to vector<8x8xf32>
    %89 = arith.select %84, %87, %88 : vector<8x8xi1>, vector<8x8xf32>
    %cst_31 = arith.constant dense<0xFF800000> : vector<8xf32>
    %90 = vector.multi_reduction <maximumf>, %89, %cst_31 [1] : vector<8x8xf32> to vector<8xf32>
    %91 = vector.shape_cast %90 : vector<8xf32> to vector<8x1xf32>
    %92 = vector.broadcast %91 : vector<8x1xf32> to vector<8x8xf32>
    %93 = arith.subf %89, %92 : vector<8x8xf32>
    %94 = math.exp %93 : vector<8x8xf32>
    %cst_32 = arith.constant dense<0.000000e+00> : vector<8xf32>
    %95 = vector.multi_reduction <add>, %94, %cst_32 [1] : vector<8x8xf32> to vector<8xf32>
    %96 = vector.shape_cast %95 : vector<8xf32> to vector<8x1xf32>
    %97 = tpu.reciprocal %96 {approx = true} : vector<8x1xf32> -> vector<8x1xf32>
    %98 = vector.broadcast %97 : vector<8x1xf32> to vector<8x8xf32>
    %99 = arith.mulf %94, %98 : vector<8x8xf32>
    %100 = arith.truncf %99 : vector<8x8xf32> to vector<8x8xbf16>
    %101 = vector.extract_strided_slice %78 {offsets = [0, 0], sizes = [8, 8], strides = [1, 1]} : vector<8x32xbf16> to vector<8x8xbf16>
    %cst_33 = arith.constant dense<0.000000e+00> : vector<8x8xf32>
    %102 = tpu.matmul %100, %101, %cst_33 {dimension_numbers = #tpu.dot_dimension_numbers<[1], [0], [0], [1], [0, 0, 1, 1], [], []>} : vector<8x8xbf16>, vector<8x8xbf16>, vector<8x8xf32> -> vector<8x8xf32>
    %103 = vector.extract_strided_slice %74 {offsets = [0, 8], sizes = [8, 8], strides = [1, 1]} : vector<8x32xbf16> to vector<8x8xbf16>
    %104 = vector.extract_strided_slice %76 {offsets = [0, 8], sizes = [8, 8], strides = [1, 1]} : vector<8x32xbf16> to vector<8x8xbf16>
    %cst_34 = arith.constant dense<0.000000e+00> : vector<8x8xf32>
    %105 = tpu.matmul %103, %104, %cst_34 {dimension_numbers = #tpu.dot_dimension_numbers<[1], [1], [0], [0], [0, 0, 1, 0], [], []>} : vector<8x8xbf16>, vector<8x8xbf16>, vector<8x8xf32> -> vector<8x8xf32>
    %cst_35 = arith.constant -1.000000e+09 : f32
    %106 = vector.broadcast %cst_35 : f32 to vector<8x8xf32>
    %107 = arith.select %84, %105, %106 : vector<8x8xi1>, vector<8x8xf32>
    %cst_36 = arith.constant dense<0xFF800000> : vector<8xf32>
    %108 = vector.multi_reduction <maximumf>, %107, %cst_36 [1] : vector<8x8xf32> to vector<8xf32>
    %109 = vector.shape_cast %108 : vector<8xf32> to vector<8x1xf32>
    %110 = vector.broadcast %109 : vector<8x1xf32> to vector<8x8xf32>
    %111 = arith.subf %107, %110 : vector<8x8xf32>
    %112 = math.exp %111 : vector<8x8xf32>
    %cst_37 = arith.constant dense<0.000000e+00> : vector<8xf32>
    %113 = vector.multi_reduction <add>, %112, %cst_37 [1] : vector<8x8xf32> to vector<8xf32>
    %114 = vector.shape_cast %113 : vector<8xf32> to vector<8x1xf32>
    %115 = tpu.reciprocal %114 {approx = true} : vector<8x1xf32> -> vector<8x1xf32>
    %116 = vector.broadcast %115 : vector<8x1xf32> to vector<8x8xf32>
    %117 = arith.mulf %112, %116 : vector<8x8xf32>
    %118 = arith.truncf %117 : vector<8x8xf32> to vector<8x8xbf16>
    %119 = vector.extract_strided_slice %78 {offsets = [0, 8], sizes = [8, 8], strides = [1, 1]} : vector<8x32xbf16> to vector<8x8xbf16>
    %cst_38 = arith.constant dense<0.000000e+00> : vector<8x8xf32>
    %120 = tpu.matmul %118, %119, %cst_38 {dimension_numbers = #tpu.dot_dimension_numbers<[1], [0], [0], [1], [0, 0, 1, 1], [], []>} : vector<8x8xbf16>, vector<8x8xbf16>, vector<8x8xf32> -> vector<8x8xf32>
    %121 = vector.extract_strided_slice %74 {offsets = [0, 16], sizes = [8, 8], strides = [1, 1]} : vector<8x32xbf16> to vector<8x8xbf16>
    %122 = vector.extract_strided_slice %76 {offsets = [0, 16], sizes = [8, 8], strides = [1, 1]} : vector<8x32xbf16> to vector<8x8xbf16>
    %cst_39 = arith.constant dense<0.000000e+00> : vector<8x8xf32>
    %123 = tpu.matmul %121, %122, %cst_39 {dimension_numbers = #tpu.dot_dimension_numbers<[1], [1], [0], [0], [0, 0, 1, 0], [], []>} : vector<8x8xbf16>, vector<8x8xbf16>, vector<8x8xf32> -> vector<8x8xf32>
    %cst_40 = arith.constant -1.000000e+09 : f32
    %124 = vector.broadcast %cst_40 : f32 to vector<8x8xf32>
    %125 = arith.select %84, %123, %124 : vector<8x8xi1>, vector<8x8xf32>
    %cst_41 = arith.constant dense<0xFF800000> : vector<8xf32>
    %126 = vector.multi_reduction <maximumf>, %125, %cst_41 [1] : vector<8x8xf32> to vector<8xf32>
    %127 = vector.shape_cast %126 : vector<8xf32> to vector<8x1xf32>
    %128 = vector.broadcast %127 : vector<8x1xf32> to vector<8x8xf32>
    %129 = arith.subf %125, %128 : vector<8x8xf32>
    %130 = math.exp %129 : vector<8x8xf32>
    %cst_42 = arith.constant dense<0.000000e+00> : vector<8xf32>
    %131 = vector.multi_reduction <add>, %130, %cst_42 [1] : vector<8x8xf32> to vector<8xf32>
    %132 = vector.shape_cast %131 : vector<8xf32> to vector<8x1xf32>
    %133 = tpu.reciprocal %132 {approx = true} : vector<8x1xf32> -> vector<8x1xf32>
    %134 = vector.broadcast %133 : vector<8x1xf32> to vector<8x8xf32>
    %135 = arith.mulf %130, %134 : vector<8x8xf32>
    %136 = arith.truncf %135 : vector<8x8xf32> to vector<8x8xbf16>
    %137 = vector.extract_strided_slice %78 {offsets = [0, 16], sizes = [8, 8], strides = [1, 1]} : vector<8x32xbf16> to vector<8x8xbf16>
    %cst_43 = arith.constant dense<0.000000e+00> : vector<8x8xf32>
    %138 = tpu.matmul %136, %137, %cst_43 {dimension_numbers = #tpu.dot_dimension_numbers<[1], [0], [0], [1], [0, 0, 1, 1], [], []>} : vector<8x8xbf16>, vector<8x8xbf16>, vector<8x8xf32> -> vector<8x8xf32>
    %139 = vector.extract_strided_slice %74 {offsets = [0, 24], sizes = [8, 8], strides = [1, 1]} : vector<8x32xbf16> to vector<8x8xbf16>
    %140 = vector.extract_strided_slice %76 {offsets = [0, 24], sizes = [8, 8], strides = [1, 1]} : vector<8x32xbf16> to vector<8x8xbf16>
    %cst_44 = arith.constant dense<0.000000e+00> : vector<8x8xf32>
    %141 = tpu.matmul %139, %140, %cst_44 {dimension_numbers = #tpu.dot_dimension_numbers<[1], [1], [0], [0], [0, 0, 1, 0], [], []>} : vector<8x8xbf16>, vector<8x8xbf16>, vector<8x8xf32> -> vector<8x8xf32>
    %cst_45 = arith.constant -1.000000e+09 : f32
    %142 = vector.broadcast %cst_45 : f32 to vector<8x8xf32>
    %143 = arith.select %84, %141, %142 : vector<8x8xi1>, vector<8x8xf32>
    %cst_46 = arith.constant dense<0xFF800000> : vector<8xf32>
    %144 = vector.multi_reduction <maximumf>, %143, %cst_46 [1] : vector<8x8xf32> to vector<8xf32>
    %145 = vector.shape_cast %144 : vector<8xf32> to vector<8x1xf32>
    %146 = vector.broadcast %145 : vector<8x1xf32> to vector<8x8xf32>
    %147 = arith.subf %143, %146 : vector<8x8xf32>
    %148 = math.exp %147 : vector<8x8xf32>
    %cst_47 = arith.constant dense<0.000000e+00> : vector<8xf32>
    %149 = vector.multi_reduction <add>, %148, %cst_47 [1] : vector<8x8xf32> to vector<8xf32>
    %150 = vector.shape_cast %149 : vector<8xf32> to vector<8x1xf32>
    %151 = tpu.reciprocal %150 {approx = true} : vector<8x1xf32> -> vector<8x1xf32>
    %152 = vector.broadcast %151 : vector<8x1xf32> to vector<8x8xf32>
    %153 = arith.mulf %148, %152 : vector<8x8xf32>
    %154 = arith.truncf %153 : vector<8x8xf32> to vector<8x8xbf16>
    %155 = vector.extract_strided_slice %78 {offsets = [0, 24], sizes = [8, 8], strides = [1, 1]} : vector<8x32xbf16> to vector<8x8xbf16>
    %cst_48 = arith.constant dense<0.000000e+00> : vector<8x8xf32>
    %156 = tpu.matmul %154, %155, %cst_48 {dimension_numbers = #tpu.dot_dimension_numbers<[1], [0], [0], [1], [0, 0, 1, 1], [], []>} : vector<8x8xbf16>, vector<8x8xbf16>, vector<8x8xf32> -> vector<8x8xf32>
    %157 = tpu.concatenate %102, %120, %138, %156 in 1 : vector<8x8xf32>, vector<8x8xf32>, vector<8x8xf32>, vector<8x8xf32> -> vector<8x32xf32>
    %158 = arith.truncf %157 : vector<8x32xf32> to vector<8x32xbf16>
    %c0_49 = arith.constant 0 : index
    %c0_50 = arith.constant 0 : index
    %159 = vector.load %arg10[%c0_49, %c0_50] : memref<32x32xbf16, #tpu.memory_space<vmem>>, vector<32x32xbf16>
    %cst_51 = arith.constant dense<0.000000e+00> : vector<8x32xf32>
    %160 = tpu.matmul %158, %159, %cst_51 {dimension_numbers = #tpu.dot_dimension_numbers<[1], [0], [0], [1], [0, 0, 1, 1], [], []>} : vector<8x32xbf16>, vector<32x32xbf16>, vector<8x32xf32> -> vector<8x32xf32>
    %c0_52 = arith.constant 0 : index
    %c0_53 = arith.constant 0 : index
    %161 = vector.load %arg11[%c0_52, %c0_53] : memref<1x32xf32, #tpu.memory_space<vmem>>, vector<1x32xf32>
    %162 = vector.shape_cast %161 : vector<1x32xf32> to vector<32xf32>
    %163 = vector.shape_cast %162 : vector<32xf32> to vector<1x32xf32>
    %164 = vector.broadcast %163 : vector<1x32xf32> to vector<8x32xf32>
    %165 = arith.addf %160, %164 : vector<8x32xf32>
    %cst_54 = arith.constant 0.707106769 : f32
    %166 = vector.broadcast %cst_54 : f32 to vector<8x32xf32>
    %167 = arith.mulf %166, %165 : vector<8x32xf32>
    %168 = arith.addf %3, %167 : vector<8x32xf32>
    %c0_55 = arith.constant 0 : index
    %c0_56 = arith.constant 0 : index
    %169 = vector.load %arg12[%c0_55, %c0_56] : memref<1x32xf32, #tpu.memory_space<vmem>>, vector<1x32xf32>
    %170 = vector.shape_cast %169 : vector<1x32xf32> to vector<32xf32>
    %c0_57 = arith.constant 0 : index
    %c0_58 = arith.constant 0 : index
    %171 = vector.load %arg13[%c0_57, %c0_58] : memref<1x32xf32, #tpu.memory_space<vmem>>, vector<1x32xf32>
    %172 = vector.shape_cast %171 : vector<1x32xf32> to vector<32xf32>
    %cst_59 = arith.constant dense<0.000000e+00> : vector<8xf32>
    %173 = vector.multi_reduction <add>, %168, %cst_59 [1] : vector<8x32xf32> to vector<8xf32>
    %174 = vector.shape_cast %173 : vector<8xf32> to vector<8x1xf32>
    %cst_60 = arith.constant 3.200000e+01 : f32
    %175 = vector.broadcast %cst_60 : f32 to vector<8x1xf32>
    %176 = arith.divf %174, %175 : vector<8x1xf32>
    %177 = vector.broadcast %176 : vector<8x1xf32> to vector<8x32xf32>
    %178 = arith.subf %168, %177 : vector<8x32xf32>
    %179 = arith.mulf %178, %178 : vector<8x32xf32>
    %cst_61 = arith.constant dense<0.000000e+00> : vector<8xf32>
    %180 = vector.multi_reduction <add>, %179, %cst_61 [1] : vector<8x32xf32> to vector<8xf32>
    %181 = vector.shape_cast %180 : vector<8xf32> to vector<8x1xf32>
    %cst_62 = arith.constant 3.200000e+01 : f32
    %182 = vector.broadcast %cst_62 : f32 to vector<8x1xf32>
    %183 = arith.divf %181, %182 : vector<8x1xf32>
    %184 = vector.broadcast %176 : vector<8x1xf32> to vector<8x32xf32>
    %185 = arith.subf %168, %184 : vector<8x32xf32>
    %cst_63 = arith.constant 9.99999974E-6 : f32
    %186 = vector.broadcast %cst_63 : f32 to vector<8x1xf32>
    %187 = arith.addf %183, %186 : vector<8x1xf32>
    %188 = math.rsqrt %187 : vector<8x1xf32>
    %189 = vector.broadcast %188 : vector<8x1xf32> to vector<8x32xf32>
    %190 = arith.mulf %185, %189 : vector<8x32xf32>
    %191 = vector.shape_cast %170 : vector<32xf32> to vector<1x32xf32>
    %192 = vector.broadcast %191 : vector<1x32xf32> to vector<8x32xf32>
    %193 = arith.mulf %190, %192 : vector<8x32xf32>
    %194 = vector.shape_cast %172 : vector<32xf32> to vector<1x32xf32>
    %195 = vector.broadcast %194 : vector<1x32xf32> to vector<8x32xf32>
    %196 = arith.addf %193, %195 : vector<8x32xf32>
    %197 = arith.truncf %196 : vector<8x32xf32> to vector<8x32xbf16>
    %c0_64 = arith.constant 0 : index
    %c0_65 = arith.constant 0 : index
    %198 = vector.load %arg14[%c0_64, %c0_65] : memref<32x128xbf16, #tpu.memory_space<vmem>>, vector<32x128xbf16>
    %cst_66 = arith.constant dense<0.000000e+00> : vector<8x128xf32>
    %199 = tpu.matmul %197, %198, %cst_66 {dimension_numbers = #tpu.dot_dimension_numbers<[1], [0], [0], [1], [0, 0, 1, 1], [], []>} : vector<8x32xbf16>, vector<32x128xbf16>, vector<8x128xf32> -> vector<8x128xf32>
    %c0_67 = arith.constant 0 : index
    %c0_68 = arith.constant 0 : index
    %200 = vector.load %arg15[%c0_67, %c0_68] : memref<1x128xf32, #tpu.memory_space<vmem>>, vector<1x128xf32>
    %201 = vector.shape_cast %200 : vector<1x128xf32> to vector<128xf32>
    %202 = vector.shape_cast %201 : vector<128xf32> to vector<1x128xf32>
    %203 = vector.broadcast %202 : vector<1x128xf32> to vector<8x128xf32>
    %204 = arith.addf %199, %203 : vector<8x128xf32>
    %cst_69 = arith.constant 5.000000e-01 : f32
    %205 = vector.broadcast %cst_69 : f32 to vector<8x128xf32>
    %206 = arith.mulf %205, %204 : vector<8x128xf32>
    %cst_70 = arith.constant 0.707106769 : f32
    %207 = vector.broadcast %cst_70 : f32 to vector<8x128xf32>
    %208 = arith.mulf %204, %207 : vector<8x128xf32>
    %209 = math.erf %208 : vector<8x128xf32>
    %cst_71 = arith.constant 1.000000e+00 : f32
    %210 = vector.broadcast %cst_71 : f32 to vector<8x128xf32>
    %211 = arith.addf %210, %209 : vector<8x128xf32>
    %212 = arith.mulf %206, %211 : vector<8x128xf32>
    %213 = arith.truncf %212 : vector<8x128xf32> to vector<8x128xbf16>
    %c0_72 = arith.constant 0 : index
    %c0_73 = arith.constant 0 : index
    %214 = vector.load %arg16[%c0_72, %c0_73] : memref<128x32xbf16, #tpu.memory_space<vmem>>, vector<128x32xbf16>
    %cst_74 = arith.constant dense<0.000000e+00> : vector<8x32xf32>
    %215 = tpu.matmul %213, %214, %cst_74 {dimension_numbers = #tpu.dot_dimension_numbers<[1], [0], [0], [1], [0, 0, 1, 1], [], []>} : vector<8x128xbf16>, vector<128x32xbf16>, vector<8x32xf32> -> vector<8x32xf32>
    %c0_75 = arith.constant 0 : index
    %c0_76 = arith.constant 0 : index
    %216 = vector.load %arg17[%c0_75, %c0_76] : memref<1x32xf32, #tpu.memory_space<vmem>>, vector<1x32xf32>
    %217 = vector.shape_cast %216 : vector<1x32xf32> to vector<32xf32>
    %218 = vector.shape_cast %217 : vector<32xf32> to vector<1x32xf32>
    %219 = vector.broadcast %218 : vector<1x32xf32> to vector<8x32xf32>
    %220 = arith.addf %215, %219 : vector<8x32xf32>
    %cst_77 = arith.constant 0.707106769 : f32
    %221 = vector.broadcast %cst_77 : f32 to vector<8x32xf32>
    %222 = arith.mulf %221, %220 : vector<8x32xf32>
    %223 = arith.addf %168, %222 : vector<8x32xf32>
    %c0_78 = arith.constant 0 : index
    %c0_79 = arith.constant 0 : index
    %c0_80 = arith.constant 0 : index
    %224 = vector.load %arg18[%c0_78, %c0_79, %c0_80] : memref<1x8x32xf32, #tpu.memory_space<vmem>>, vector<1x8x32xf32>
    %225 = vector.shape_cast %224 : vector<1x8x32xf32> to vector<8x32xf32>
    %226 = vector.shape_cast %223 : vector<8x32xf32> to vector<1x8x32xf32>
    tpu.vector_store %arg18[%c0_78, %c0_79, %c0_80], %226 {strides = array<i32>} : memref<1x8x32xf32, #tpu.memory_space<vmem>>, vector<1x8x32xf32>,
    return
  }
  func.func @transform_0(%arg0: i32, %arg1: i32) -> (i32, i32, i32) {
    %c0_i32 = arith.constant 0 : i32
    %c0_i32_0 = arith.constant 0 : i32
    %c0_i32_1 = arith.constant 0 : i32
    return %arg0, %c0_i32, %c0_i32_0 : i32, i32, i32
  }
  func.func @transform_1(%arg0: i32, %arg1: i32) -> (i32, i32, i32) {
    %c0_i32 = arith.constant 0 : i32
    %c0_i32_0 = arith.constant 0 : i32
    return %arg0, %arg1, %c0_i32 : i32, i32, i32
  }
  func.func @transform_2(%arg0: i32, %arg1: i32) -> (i32, i32) {
    %c0_i32 = arith.constant 0 : i32
    %c0_i32_0 = arith.constant 0 : i32
    %c0_i32_1 = arith.constant 0 : i32
    return %c0_i32, %c0_i32_0 : i32, i32
  }
  func.func @transform_3(%arg0: i32, %arg1: i32) -> (i32, i32) {
    %c0_i32 = arith.constant 0 : i32
    %c0_i32_0 = arith.constant 0 : i32
    %c0_i32_1 = arith.constant 0 : i32
    return %c0_i32, %c0_i32_0 : i32, i32
  }
  func.func @transform_4(%arg0: i32, %arg1: i32) -> (i32, i32) {
    %c0_i32 = arith.constant 0 : i32
    %c0_i32_0 = arith.constant 0 : i32
    %c0_i32_1 = arith.constant 0 : i32
    return %c0_i32, %c0_i32_0 : i32, i32
  }
  func.func @transform_5(%arg0: i32, %arg1: i32) -> (i32, i32) {
    %c0_i32 = arith.constant 0 : i32
    %c0_i32_0 = arith.constant 0 : i32
    %c0_i32_1 = arith.constant 0 : i32
    return %c0_i32, %c0_i32_0 : i32, i32
  }
  func.func @transform_6(%arg0: i32, %arg1: i32) -> (i32, i32) {
    %c0_i32 = arith.constant 0 : i32
    %c0_i32_0 = arith.constant 0 : i32
    %c0_i32_1 = arith.constant 0 : i32
    return %c0_i32, %c0_i32_0 : i32, i32
  }
  func.func @transform_7(%arg0: i32, %arg1: i32) -> (i32, i32) {
    %c0_i32 = arith.constant 0 : i32
    %c0_i32_0 = arith.constant 0 : i32
    %c0_i32_1 = arith.constant 0 : i32
    return %c0_i32, %c0_i32_0 : i32, i32
  }
  func.func @transform_8(%arg0: i32, %arg1: i32) -> (i32, i32) {
    %c0_i32 = arith.constant 0 : i32
    %c0_i32_0 = arith.constant 0 : i32
    %c0_i32_1 = arith.constant 0 : i32
    return %c0_i32, %c0_i32_0 : i32, i32
  }
  func.func @transform_9(%arg0: i32, %arg1: i32) -> (i32, i32) {
    %c0_i32 = arith.constant 0 : i32
    %c0_i32_0 = arith.constant 0 : i32
    %c0_i32_1 = arith.constant 0 : i32
    return %c0_i32, %c0_i32_0 : i32, i32
  }
  func.func @transform_10(%arg0: i32, %arg1: i32) -> (i32, i32) {
    %c0_i32 = arith.constant 0 : i32
    %c0_i32_0 = arith.constant 0 : i32
    %c0_i32_1 = arith.constant 0 : i32
    return %c0_i32, %c0_i32_0 : i32, i32
  }
  func.func @transform_11(%arg0: i32, %arg1: i32) -> (i32, i32) {
    %c0_i32 = arith.constant 0 : i32
    %c0_i32_0 = arith.constant 0 : i32
    %c0_i32_1 = arith.constant 0 : i32
    return %c0_i32, %c0_i32_0 : i32, i32
  }
  func.func @transform_12(%arg0: i32, %arg1: i32) -> (i32, i32) {
    %c0_i32 = arith.constant 0 : i32
    %c0_i32_0 = arith.constant 0 : i32
    %c0_i32_1 = arith.constant 0 : i32
    return %c0_i32, %c0_i32_0 : i32, i32
  }
  func.func @transform_13(%arg0: i32, %arg1: i32) -> (i32, i32) {
    %c0_i32 = arith.constant 0 : i32
    %c0_i32_0 = arith.constant 0 : i32
    %c0_i32_1 = arith.constant 0 : i32
    return %c0_i32, %c0_i32_0 : i32, i32
  }
  func.func @transform_14(%arg0: i32, %arg1: i32) -> (i32, i32) {
    %c0_i32 = arith.constant 0 : i32
    %c0_i32_0 = arith.constant 0 : i32
    %c0_i32_1 = arith.constant 0 : i32
    return %c0_i32, %c0_i32_0 : i32, i32
  }
  func.func @transform_15(%arg0: i32, %arg1: i32) -> (i32, i32) {
    %c0_i32 = arith.constant 0 : i32
    %c0_i32_0 = arith.constant 0 : i32
    %c0_i32_1 = arith.constant 0 : i32
    return %c0_i32, %c0_i32_0 : i32, i32
  }
  func.func @transform_16(%arg0: i32, %arg1: i32) -> (i32, i32, i32) {
    %c0_i32 = arith.constant 0 : i32
    %c0_i32_0 = arith.constant 0 : i32
    return %arg0, %arg1, %c0_i32 : i32, i32, i32
  }
}

</mosaic_0001>

<bundles_post_ra>
// kernel: tpu_custom_call.1
= control target key start
LH: loop header
LB: loop body
LE: loop exit
PB: predicated region body
PF: predicated region fallthrough
CT: control target
= control target key end

     0   :  { %s3815_s0 = inlined_call_operand.hbm [shape: f32[2,8,32], index: 0, kind: input, shape index: {}]   ;;  %s3816_s1 = inlined_call_operand.hbm [shape: f32[2,8,32], index: 1, kind: input, shape index: {}]   ;;  %s3817_s2 = inlined_call_operand.hbm [shape: f32[1,32], index: 2, kind: input, shape index: {}]   ;;  %s3818_s3 = inlined_call_operand.hbm [shape: f32[1,32], index: 3, kind: input, shape index: {}]   ;;  %s3819_s4 = inlined_call_operand.hbm [shape: bf16[32,32], index: 4, kind: input, shape index: {}]   ;;  %s3820_s5 = inlined_call_operand.hbm [shape: f32[1,32], index: 5, kind: input, shape index: {}]   ;;  %s3821_s6 = inlined_call_operand.hbm [shape: bf16[32,64], index: 6, kind: input, shape index: {}]   ;;  %s3822_s7 = inlined_call_operand.hbm [shape: f32[1,64], index: 7, kind: input, shape index: {}]   ;;  %s3823_s8 = inlined_call_operand.hbm [shape: bf16[32,32], index: 8, kind: input, shape index: {}]   ;;  %s3824_s9 = inlined_call_operand.hbm [shape: f32[1,32], index: 9, kind: input, shape index: {}]   ;;  %s3825_s10 = inlined_call_operand.hbm [shape: f32[1,32], index: 10, kind: input, shape index: {}]   ;;  %s3826_s11 = inlined_call_operand.hbm [shape: f32[1,32], index: 11, kind: input, shape index: {}]   ;;  %s3827_s12 = inlined_call_operand.hbm [shape: bf16[32,128], index: 12, kind: input, shape index: {}]   ;;  %s3828_s13 = inlined_call_operand.hbm [shape: f32[1,128], index: 13, kind: input, shape index: {}]   ;;  %s3829_s14 = inlined_call_operand.hbm [shape: bf16[128,32], index: 14, kind: input, shape index: {}]   ;;  %s3830_s15 = inlined_call_operand.hbm [shape: f32[1,32], index: 15, kind: input, shape index: {}]   ;;  %s3831_s16 = inlined_call_operand.hbm [shape: f32[2,8,32], index: 16, kind: output, shape index: {}]  }
   0x1   :  { %3844 = sst [smem:[#allocation45_spill]] %s3815_s0 }
   0x2   :  { %3845 = sst [smem:[#allocation46_spill]] %s3816_s1 }
   0x3   :  { %3846 = sst [smem:[#allocation47_spill]] %s3817_s2 }
   0x4   :  { %3847 = sst [smem:[#allocation48_spill]] %s3818_s3 }
   0x5   :  { %3848 = sst [smem:[#allocation49_spill]] %s3819_s4 }
   0x6   :  { %3849 = sst [smem:[#allocation50_spill]] %s3820_s5 }
   0x7   :  { %3850 = sst [smem:[#allocation51_spill]] %s3821_s6 }
   0x8   :  { %3851 = sst [smem:[#allocation52_spill]] %s3822_s7 }
   0x9   :  { %3852 = sst [smem:[#allocation53_spill]] %s3823_s8 }
   0xa   :  { %3853 = sst [smem:[#allocation54_spill]] %s3824_s9 }
   0xb   :  { %3854 = sst [smem:[#allocation55_spill]] %s3825_s10 }
   0xc   :  { %3855 = sst [smem:[#allocation56_spill]] %s3831_s16 }
   0xd   :  { %21 = vsyncpa [#allocation3], 0 }
   0xe   :  { %23 = vsyncpa [#allocation3 + $0x1], 0 }
   0xf   :  { %24 = vsyncpa [#allocation6], 0 }
  0x10   :  { %26 = vsyncpa [#allocation6 + $0x1], 0 }
  0x11   :  { %27 = vsyncpa [#allocation9], 0 }
  0x12   :  { %28 = vsyncpa [#allocation12], 0 }
  0x13   :  { %29 = vsyncpa [#allocation15], 0 }
  0x14   :  { %30 = vsyncpa [#allocation18], 0 }
  0x15   :  { %31 = vsyncpa [#allocation21], 0 }
  0x16   :  { %32 = vsyncpa [#allocation24], 0 }
  0x17   :  { %33 = vsyncpa [#allocation27], 0 }
  0x18   :  { %34 = vsyncpa [#allocation4], 0 }
  0x19   :  { %36 = vsyncpa [#allocation4 + $0x1], 0  ;;  %s3135_s21 = smov 0   ;;  %s3137_s22 = smov 0  }
  0x1a   :  { %s3139_s23 = smov 0   ;;  %s3141_s24 = smov 0  }
  0x1b   :  { %s3143_s25 = smov 0   ;;  %s3145_s26 = smov 0  }
  0x1c LB: > { %3856 = sst [smem:[#allocation40_spill]] %s2997_s21  ;;  %s3166_s27 = sadd.s32 4294967295, %s3017_s26   ;;  %s3017_s26 = sphi %s3145_s26, %s42_s26   ;;  %s3013_s25 = sphi %s3143_s25, %s3915_s25   ;;  %s3009_s24 = sphi %s3141_s24, %s3914_s24   ;;  %s3005_s23 = sphi %s3139_s23, %s3913_s23   ;;  %s3001_s22 = sphi %s3137_s22, %s3912_s22   ;;  %s2997_s21 = sphi %s3135_s21, %s3911_s21  }
  0x1d   : > { %3857 = sst [smem:[#allocation41_spill]] %s3001_s22  ;;  %p1969_p0 = scmp.ge.s32.totalorder %s3017_s26, 1 }
  0x1e   : > { %3858 = sst [smem:[#allocation42_spill]] %s3009_s24  ;;  %p3839_p1 = scmp.eq.s32.totalorder %s3166_s27, 0 }
  0x1f   : > { %3859 = sst [smem:[#allocation43_spill]] %s3166_s27  ;;  %p435_p2 = scmp.lt.s32.totalorder %s3017_s26, 3 }
  0x20   : > { %s3019_s29 = smov [#allocation7]   ;;  %s3020_s0 = smov [#allocation8]  }
  0x21   : > { %p3171_p3 = pnand %p1969_p0, %p435_p2  ;;  %s448_s30 = sshll.u32 %s3019_s29, 4  ;;  %s449_s30 = int_to_ptr.vmem [resolvable:$true] %s448_s30 }
  0x22   : > { %s459_s17 = sshll.u32 %s3020_s0, 4  ;;  %s3021_s19 = smov [#allocation11]   ;;  %s3184_s17 = int_to_ptr.vmem [resolvable:$true] %s459_s17 }
  0x23   : > { %s3860_s28 = scalar_select %p3171_p3, 1, 0 }
  0x24   : > { %p2247_p5 = pneg %p3171_p3  ;;  %s483_s20 = sshll.u32 %s3021_s19, 4  ;;  %s3186_s20 = int_to_ptr.vmem [resolvable:$true] %s483_s20 }
  0x25   : > { %3861 = sst [smem:[#allocation44_spill]] %s3860_s28  ;;  %s3863_s2 = sld [smem:[#allocation47_spill]] }
  0x26   : > { %p3180_p6 = pnand %p2247_p5, %p3839_p1 }
  0x28   : > { %p3196_p8 = pneg %p3180_p6 }
  0x2b   : > { %s2447_s24 = scalar_lea.hbm %s3863_s2, 16 }
  0x2c   : > { %p2448_p7 = scmp.ne.s32.totalorder %s3863_s2, %s2447_s24  ;;  %p2454_p11 = scmp.lt.u32.totalorder %s2447_s24, %s3863_s2 }
  0x2e   : > { %p2450_p9 = pnand %p3196_p8, %p2448_p7 }
  0x30   : > { %p2451_p10 = pneg %p2450_p9 }
  0x32   : > { %p2456_p12 = pnand %p2454_p11, %p2451_p10 }
  0x34   : > { %2459 = shalt.err (!%p2456_p12)
}
  0x35   : > { %s2460_s16 = scalar_lea.vmem %s449_s30, 16  ;;  %s2467_s1 = scalar_lea.vmem %s449_s30, 32 }
  0x36   : > { %p2461_p13 = scmp.ne.s32.totalorder %s449_s30, %s2460_s16  ;;  %p2468_p5 = scmp.lt.s32.totalorder %s449_s30, %s449_s30 }
  0x37   : > { %p2469_p4 = scmp.lt.s32.totalorder %s2467_s1, %s2460_s16 }
  0x38   : > { %p2463_p0 = pnand %p2461_p13, %p3196_p8 }
  0x39   : > { %p2470_p1 = por %p2469_p4, %p2468_p5 }
  0x3a   : > { %p2464_p2 = pneg %p2463_p0 }
  0x3c   : > { %p2471_p3 = pnand %p2470_p1, %p2464_p2 }
  0x3e   : > { %2474 = shalt.err (!%p2471_p3)
}
  0x3f   : > { %2250 = dma.hbm_to_vmem [thread:$0]  (!%p3180_p6), %s3863_s2, 16, %s449_s30, [#allocation6]  }
  0x40   : > { %s3865_s3 = sld [smem:[#allocation48_spill]] }
  0x46   : > { %s2475_s19 = scalar_lea.hbm %s3865_s3, 16 }
  0x47   : > { %p2476_p7 = scmp.ne.s32.totalorder %s3865_s3, %s2475_s19  ;;  %p2482_p1 = scmp.lt.u32.totalorder %s2475_s19, %s3865_s3 }
  0x49   : > { %p2478_p9 = pnand %p2476_p7, %p3196_p8 }
  0x4b   : > { %p2479_p4 = pneg %p2478_p9 }
  0x4d   : > { %p2484_p3 = pnand %p2482_p1, %p2479_p4 }
  0x4f   : > { %2487 = shalt.err (!%p2484_p3)
}
  0x50   : > { %s2488_s30 = scalar_lea.vmem %s3184_s17, 16  ;;  %s2495_s21 = scalar_lea.vmem %s3184_s17, 32 }
  0x51   : > { %p2489_p10 = scmp.ne.s32.totalorder %s3184_s17, %s2488_s30  ;;  %p2496_p13 = scmp.lt.s32.totalorder %s3184_s17, %s3184_s17 }
  0x52   : > { %p2497_p0 = scmp.lt.s32.totalorder %s2495_s21, %s2488_s30 }
  0x53   : > { %p2491_p11 = pnand %p2489_p10, %p3196_p8 }
  0x54   : > { %p2498_p2 = por %p2497_p0, %p2496_p13 }
  0x55   : > { %p2492_p12 = pneg %p2491_p11 }
  0x57   : > { %p2499_p5 = pnand %p2498_p2, %p2492_p12 }
  0x59   : > { %2502 = shalt.err (!%p2499_p5)
}
  0x5a   : > { %2253 = dma.hbm_to_vmem [thread:$0]  (!%p3180_p6), %s3865_s3, 16, %s3184_s17, [#allocation9]  }
  0x5b   : > { %s3866_s5 = sld [smem:[#allocation50_spill]] }
  0x61   : > { %s2503_s27 = scalar_lea.hbm %s3866_s5, 16 }
  0x62   : > { %p2504_p7 = scmp.ne.s32.totalorder %s3866_s5, %s2503_s27  ;;  %p2510_p1 = scmp.lt.u32.totalorder %s2503_s27, %s3866_s5 }
  0x64   : > { %p2506_p9 = pnand %p2504_p7, %p3196_p8 }
  0x66   : > { %p2507_p4 = pneg %p2506_p9 }
  0x68   : > { %p2512_p3 = pnand %p2510_p1, %p2507_p4 }
  0x6a   : > { %2515 = shalt.err (!%p2512_p3)
}
  0x6b   : > { %s2516_s17 = scalar_lea.vmem %s3186_s20, 16  ;;  %s2523_s21 = scalar_lea.vmem %s3186_s20, 32 }
  0x6c   : > { %p2517_p10 = scmp.ne.s32.totalorder %s3186_s20, %s2516_s17  ;;  %p2524_p13 = scmp.lt.s32.totalorder %s3186_s20, %s3186_s20 }
  0x6d   : > { %p2525_p0 = scmp.lt.s32.totalorder %s2523_s21, %s2516_s17 }
  0x6e   : > { %p2519_p11 = pnand %p2517_p10, %p3196_p8 }
  0x6f   : > { %p2526_p2 = por %p2525_p0, %p2524_p13 }
  0x70   : > { %p2520_p12 = pneg %p2519_p11 }
  0x72   : > { %p2527_p5 = pnand %p2526_p2, %p2520_p12 }
  0x74   : > { %2530 = shalt.err (!%p2527_p5)
}
  0x75   : > { %2259 = dma.hbm_to_vmem [thread:$0]  (!%p3180_p6), %s3866_s5, 16, %s3186_s20, [#allocation12]  }
  0x76   : > { %s3022_s29 = smov [#allocation14]   ;;  %s3023_s27 = smov [#allocation17]  }
  0x77   : > { %s507_s24 = sshll.u32 %s3022_s29, 4  ;;  %s531_s19 = sshll.u32 %s3023_s27, 4  ;;  %s508_s24 = int_to_ptr.vmem [resolvable:$true] %s507_s24  ;;  %s532_s19 = int_to_ptr.vmem [resolvable:$true] %s531_s19 }
  0x78   : > { %s3867_s7 = sld [smem:[#allocation52_spill]] }
  0x7e   : > { %s2531_s30 = scalar_lea.hbm %s3867_s7, 16 }
  0x7f   : > { %p2532_p7 = scmp.ne.s32.totalorder %s3867_s7, %s2531_s30  ;;  %p2538_p1 = scmp.lt.u32.totalorder %s2531_s30, %s3867_s7 }
  0x81   : > { %p2534_p9 = pnand %p2532_p7, %p3196_p8 }
  0x83   : > { %p2535_p4 = pneg %p2534_p9 }
  0x85   : > { %p2540_p3 = pnand %p2538_p1, %p2535_p4 }
  0x87   : > { %2543 = shalt.err (!%p2540_p3)
}
  0x88   : > { %s2544_s20 = scalar_lea.vmem %s508_s24, 16  ;;  %s2551_s28 = scalar_lea.vmem %s508_s24, 32 }
  0x89   : > { %p2545_p10 = scmp.ne.s32.totalorder %s508_s24, %s2544_s20  ;;  %p2552_p13 = scmp.lt.s32.totalorder %s508_s24, %s508_s24 }
  0x8a   : > { %p2553_p0 = scmp.lt.s32.totalorder %s2551_s28, %s2544_s20 }
  0x8b   : > { %p2547_p11 = pnand %p2545_p10, %p3196_p8 }
  0x8c   : > { %p2554_p2 = por %p2553_p0, %p2552_p13 }
  0x8d   : > { %p2548_p12 = pneg %p2547_p11 }
  0x8f   : > { %p2555_p5 = pnand %p2554_p2, %p2548_p12 }
  0x91   : > { %2558 = shalt.err (!%p2555_p5)
}
  0x92   : > { %2265 = dma.hbm_to_vmem [thread:$0]  (!%p3180_p6), %s3867_s7, 16, %s508_s24, [#allocation15]  }
  0x93   : > { %s3868_s9 = sld [smem:[#allocation54_spill]] }
  0x99   : > { %s2559_s1 = scalar_lea.hbm %s3868_s9, 16 }
  0x9a   : > { %p2560_p7 = scmp.ne.s32.totalorder %s3868_s9, %s2559_s1  ;;  %p2566_p1 = scmp.lt.u32.totalorder %s2559_s1, %s3868_s9 }
  0x9c   : > { %p2562_p9 = pnand %p2560_p7, %p3196_p8 }
  0x9e   : > { %p2563_p4 = pneg %p2562_p9 }
  0xa0   : > { %p2568_p3 = pnand %p2566_p1, %p2563_p4 }
  0xa2   : > { %2571 = shalt.err (!%p2568_p3)
}
  0xa3   : > { %s2572_s20 = scalar_lea.vmem %s532_s19, 16  ;;  %s2579_s24 = scalar_lea.vmem %s532_s19, 32 }
  0xa4   : > { %p2573_p10 = scmp.ne.s32.totalorder %s532_s19, %s2572_s20  ;;  %p2580_p13 = scmp.lt.s32.totalorder %s532_s19, %s532_s19 }
  0xa5   : > { %p2581_p0 = scmp.lt.s32.totalorder %s2579_s24, %s2572_s20 }
  0xa6   : > { %p2575_p11 = pnand %p2573_p10, %p3196_p8 }
  0xa7   : > { %p2582_p2 = por %p2581_p0, %p2580_p13 }
  0xa8   : > { %p2576_p12 = pneg %p2575_p11 }
  0xaa   : > { %p2583_p5 = pnand %p2582_p2, %p2576_p12 }
  0xac   : > { %2586 = shalt.err (!%p2583_p5)
}
  0xad   : > { %2271 = dma.hbm_to_vmem [thread:$0]  (!%p3180_p6), %s3868_s9, 16, %s532_s19, [#allocation18]  }
  0xae   : > { %s3024_s27 = smov [#allocation20]   ;;  %s3025_s16 = smov [#allocation23]  }
  0xaf   : > { %s553_s2 = sshll.u32 %s3024_s27, 4  ;;  %s577_s1 = sshll.u32 %s3025_s16, 4  ;;  %s554_s2 = int_to_ptr.vmem [resolvable:$true] %s553_s2  ;;  %s578_s1 = int_to_ptr.vmem [resolvable:$true] %s577_s1 }
  0xb0   : > { %s2587_s21 = scalar_lea.hbm %s3826_s11, 16 }
  0xb1   : > { %p2588_p7 = scmp.ne.s32.totalorder %s3826_s11, %s2587_s21  ;;  %p2594_p1 = scmp.lt.u32.totalorder %s2587_s21, %s3826_s11 }
  0xb3   : > { %p2590_p9 = pnand %p2588_p7, %p3196_p8 }
  0xb5   : > { %p2591_p4 = pneg %p2590_p9 }
  0xb7   : > { %p2596_p3 = pnand %p2594_p1, %p2591_p4 }
  0xb9   : > { %2599 = shalt.err (!%p2596_p3)
}
  0xba   : > { %s2600_s19 = scalar_lea.vmem %s554_s2, 16  ;;  %s2607_s29 = scalar_lea.vmem %s554_s2, 32 }
  0xbb   : > { %p2601_p10 = scmp.ne.s32.totalorder %s554_s2, %s2600_s19  ;;  %p2608_p13 = scmp.lt.s32.totalorder %s554_s2, %s554_s2 }
  0xbc   : > { %p2609_p0 = scmp.lt.s32.totalorder %s2607_s29, %s2600_s19 }
  0xbd   : > { %p2603_p11 = pnand %p2601_p10, %p3196_p8 }
  0xbe   : > { %p2610_p2 = por %p2609_p0, %p2608_p13 }
  0xbf   : > { %p2604_p12 = pneg %p2603_p11 }
  0xc1   : > { %p2611_p5 = pnand %p2610_p2, %p2604_p12 }
  0xc3   : > { %2614 = shalt.err (!%p2611_p5)
}
  0xc4   : > { %2277 = dma.hbm_to_vmem [thread:$0]  (!%p3180_p6), %s3826_s11, 16, %s554_s2, [#allocation21]  }
  0xc5   : > { %s2615_s21 = scalar_lea.hbm %s3828_s13, 16 }
  0xc6   : > { %p2616_p7 = scmp.ne.s32.totalorder %s3828_s13, %s2615_s21  ;;  %p2622_p1 = scmp.lt.u32.totalorder %s2615_s21, %s3828_s13 }
  0xc8   : > { %p2618_p9 = pnand %p2616_p7, %p3196_p8 }
  0xca   : > { %p2619_p4 = pneg %p2618_p9 }
  0xcc   : > { %p2624_p3 = pnand %p2622_p1, %p2619_p4 }
  0xce   : > { %2627 = shalt.err (!%p2624_p3)
}
  0xcf   : > { %s2628_s19 = scalar_lea.vmem %s578_s1, 16  ;;  %s2635_s2 = scalar_lea.vmem %s578_s1, 32 }
  0xd0   : > { %p2629_p10 = scmp.ne.s32.totalorder %s578_s1, %s2628_s19  ;;  %p2636_p13 = scmp.lt.s32.totalorder %s578_s1, %s578_s1 }
  0xd1   : > { %p2637_p0 = scmp.lt.s32.totalorder %s2635_s2, %s2628_s19 }
  0xd2   : > { %p2631_p11 = pnand %p2629_p10, %p3196_p8 }
  0xd3   : > { %p2638_p2 = por %p2637_p0, %p2636_p13 }
  0xd4   : > { %p2632_p12 = pneg %p2631_p11 }
  0xd6   : > { %p2639_p5 = pnand %p2638_p2, %p2632_p12 }
  0xd8   : > { %2642 = shalt.err (!%p2639_p5)
}
  0xd9   : > { %2283 = dma.hbm_to_vmem [thread:$0]  (!%p3180_p6), %s3828_s13, 16, %s578_s1, [#allocation24]  }
  0xda   : > { %s3026_s16 = smov [#allocation10]   ;;  %s3869_s4 = sld [smem:[#allocation49_spill]] }
  0xdb   : > { %s469_s30 = sshll.u32 %s3026_s16, 4  ;;  %s470_s30 = int_to_ptr.vmem [resolvable:$true] %s469_s30 }
  0xe0   : > { %s2643_s22 = scalar_lea.hbm %s3869_s4, 256 }
  0xe1   : > { %p2644_p7 = scmp.ne.s32.totalorder %s3869_s4, %s2643_s22  ;;  %p2650_p1 = scmp.lt.u32.totalorder %s2643_s22, %s3869_s4 }
  0xe3   : > { %p2646_p9 = pnand %p2644_p7, %p3196_p8 }
  0xe5   : > { %p2647_p4 = pneg %p2646_p9 }
  0xe7   : > { %p2652_p3 = pnand %p2650_p1, %p2647_p4 }
  0xe9   : > { %2655 = shalt.err (!%p2652_p3)
}
  0xea   : > { %s2656_s1 = scalar_lea.vmem %s470_s30, 256  ;;  %p2664_p13 = scmp.lt.s32.totalorder %s470_s30, %s470_s30 }
  0xeb   : > { %p2657_p10 = scmp.ne.s32.totalorder %s470_s30, %s2656_s1  ;;  %p2665_p0 = scmp.lt.s32.totalorder %s2656_s1, %s2656_s1 }
  0xed   : > { %p2659_p11 = pnand %p2657_p10, %p3196_p8  ;;  %p2666_p2 = por %p2665_p0, %p2664_p13 }
  0xef   : > { %p2660_p12 = pneg %p2659_p11 }
  0xf1   : > { %p2667_p5 = pnand %p2666_p2, %p2660_p12 }
  0xf3   : > { %2670 = shalt.err (!%p2667_p5)
}
  0xf4   : > { %s3027_s2 = smov 64   ;;  %s3028_s29 = smov 4  }
  0xf5   : > { %2256 = dma.hbm_to_vmem [thread:$0]  (!%p3180_p6), %s3869_s4, 256, %s470_s30, [#allocation9], %s3027_s2, %s3027_s2, %s3028_s29  }
  0xf6   : > { %s3029_s17 = smov [#allocation13]   ;;  %s3030_s22 = smov [#allocation16]  }
  0xf7   : > { %s493_s21 = sshll.u32 %s3029_s17, 4  ;;  %s517_s20 = sshll.u32 %s3030_s22, 4  ;;  %s494_s21 = int_to_ptr.vmem [resolvable:$true] %s493_s21  ;;  %s3353_s20 = int_to_ptr.vmem [resolvable:$true] %s517_s20 }
  0xf8   : > { %s3870_s6 = sld [smem:[#allocation51_spill]] }
  0xfe   : > { %s2671_s19 = scalar_lea.hbm %s3870_s6, 256 }
  0xff   : > { %p2672_p7 = scmp.ne.s32.totalorder %s3870_s6, %s2671_s19  ;;  %p2678_p1 = scmp.lt.u32.totalorder %s2671_s19, %s3870_s6 }
 0x101   : > { %p2674_p9 = pnand %p2672_p7, %p3196_p8 }
 0x103   : > { %p2675_p4 = pneg %p2674_p9 }
 0x105   : > { %p2680_p3 = pnand %p2678_p1, %p2675_p4 }
 0x107   : > { %2683 = shalt.err (!%p2680_p3)
}
 0x108   : > { %s2684_s16 = scalar_lea.vmem %s494_s21, 256  ;;  %p2692_p13 = scmp.lt.s32.totalorder %s494_s21, %s494_s21 }
 0x109   : > { %p2685_p10 = scmp.ne.s32.totalorder %s494_s21, %s2684_s16  ;;  %p2693_p0 = scmp.lt.s32.totalorder %s2684_s16, %s2684_s16 }
 0x10b   : > { %p2687_p11 = pnand %p2685_p10, %p3196_p8  ;;  %p2694_p2 = por %p2693_p0, %p2692_p13 }
 0x10d   : > { %p2688_p12 = pneg %p2687_p11 }
 0x10f   : > { %p2695_p5 = pnand %p2694_p2, %p2688_p12 }
 0x111   : > { %2698 = shalt.err (!%p2695_p5)
}
 0x112   : > { %2262 = dma.hbm_to_vmem [thread:$0]  (!%p3180_p6), %s3870_s6, 256, %s494_s21, [#allocation12], %s3027_s2, %s3027_s2, %s3028_s29  }
 0x113   : > { %s3871_s8 = sld [smem:[#allocation53_spill]] }
 0x119   : > { %s2699_s28 = scalar_lea.hbm %s3871_s8, 256 }
 0x11a   : > { %p2700_p7 = scmp.ne.s32.totalorder %s3871_s8, %s2699_s28  ;;  %p2706_p1 = scmp.lt.u32.totalorder %s2699_s28, %s3871_s8 }
 0x11c   : > { %p2702_p9 = pnand %p2700_p7, %p3196_p8 }
 0x11e   : > { %p2703_p4 = pneg %p2702_p9 }
 0x120   : > { %p2708_p3 = pnand %p2706_p1, %p2703_p4 }
 0x122   : > { %2711 = shalt.err (!%p2708_p3)
}
 0x123   : > { %s2712_s21 = scalar_lea.vmem %s3353_s20, 256  ;;  %p2720_p13 = scmp.lt.s32.totalorder %s3353_s20, %s3353_s20 }
 0x124   : > { %p2713_p10 = scmp.ne.s32.totalorder %s3353_s20, %s2712_s21  ;;  %p2721_p0 = scmp.lt.s32.totalorder %s2712_s21, %s2712_s21 }
 0x126   : > { %p2715_p11 = pnand %p2713_p10, %p3196_p8  ;;  %p2722_p2 = por %p2721_p0, %p2720_p13 }
 0x128   : > { %p2716_p12 = pneg %p2715_p11 }
 0x12a   : > { %p2723_p5 = pnand %p2722_p2, %p2716_p12 }
 0x12c   : > { %2726 = shalt.err (!%p2723_p5)
}
 0x12d   : > { %2268 = dma.hbm_to_vmem [thread:$0]  (!%p3180_p6), %s3871_s8, 256, %s3353_s20, [#allocation15], %s3027_s2, %s3027_s2, %s3028_s29  }
 0x12e   : > { %s3031_s17 = smov [#allocation19]   ;;  %s3032_s24 = smov [#allocation22]  }
 0x12f   : > { %s542_s22 = sshll.u32 %s3031_s17, 4  ;;  %s563_s28 = sshll.u32 %s3032_s24, 4  ;;  %s543_s22 = int_to_ptr.vmem [resolvable:$true] %s542_s22  ;;  %s3402_s28 = int_to_ptr.vmem [resolvable:$true] %s563_s28 }
 0x130   : > { %s3872_s10 = sld [smem:[#allocation55_spill]] }
 0x136   : > { %s2727_s27 = scalar_lea.hbm %s3872_s10, 16 }
 0x137   : > { %p2728_p7 = scmp.ne.s32.totalorder %s3872_s10, %s2727_s27  ;;  %p2734_p1 = scmp.lt.u32.totalorder %s2727_s27, %s3872_s10 }
 0x139   : > { %p2730_p9 = pnand %p2728_p7, %p3196_p8 }
 0x13b   : > { %p2731_p4 = pneg %p2730_p9 }
 0x13d   : > { %p2736_p3 = pnand %p2734_p1, %p2731_p4 }
 0x13f   : > { %2739 = shalt.err (!%p2736_p3)
}
 0x140   : > { %s2740_s3 = scalar_lea.vmem %s543_s22, 16  ;;  %s2747_s17 = scalar_lea.vmem %s543_s22, 32 }
 0x141   : > { %p2741_p10 = scmp.ne.s32.totalorder %s543_s22, %s2740_s3  ;;  %p2748_p13 = scmp.lt.s32.totalorder %s543_s22, %s543_s22 }
 0x142   : > { %p2749_p0 = scmp.lt.s32.totalorder %s2747_s17, %s2740_s3 }
 0x143   : > { %p2743_p11 = pnand %p2741_p10, %p3196_p8 }
 0x144   : > { %p2750_p2 = por %p2749_p0, %p2748_p13 }
 0x145   : > { %p2744_p12 = pneg %p2743_p11 }
 0x147   : > { %p2751_p5 = pnand %p2750_p2, %p2744_p12 }
 0x149   : > { %2754 = shalt.err (!%p2751_p5)
}
 0x14a   : > { %2274 = dma.hbm_to_vmem [thread:$0]  (!%p3180_p6), %s3872_s10, 16, %s543_s22, [#allocation18]  }
 0x14b   : > { %s2755_s30 = scalar_lea.hbm %s3827_s12, 256 }
 0x14c   : > { %p2756_p7 = scmp.ne.s32.totalorder %s3827_s12, %s2755_s30  ;;  %p2762_p1 = scmp.lt.u32.totalorder %s2755_s30, %s3827_s12 }
 0x14e   : > { %p2758_p9 = pnand %p2756_p7, %p3196_p8 }
 0x150   : > { %p2759_p4 = pneg %p2758_p9 }
 0x152   : > { %p2764_p3 = pnand %p2762_p1, %p2759_p4 }
 0x154   : > { %2767 = shalt.err (!%p2764_p3)
}
 0x155   : > { %s2768_s22 = scalar_lea.vmem %s3402_s28, 256  ;;  %p2776_p13 = scmp.lt.s32.totalorder %s3402_s28, %s3402_s28 }
 0x156   : > { %p2769_p10 = scmp.ne.s32.totalorder %s3402_s28, %s2768_s22  ;;  %p2777_p0 = scmp.lt.s32.totalorder %s2768_s22, %s2768_s22 }
 0x158   : > { %p2771_p11 = pnand %p2769_p10, %p3196_p8  ;;  %p2778_p2 = por %p2777_p0, %p2776_p13 }
 0x15a   : > { %p2772_p12 = pneg %p2771_p11 }
 0x15c   : > { %p2779_p5 = pnand %p2778_p2, %p2772_p12 }
 0x15e   : > { %2782 = shalt.err (!%p2779_p5)
}
 0x15f   : > { %2280 = dma.hbm_to_vmem [thread:$0]  (!%p3180_p6), %s3827_s12, 256, %s3402_s28, [#allocation21], %s3027_s2, %s3027_s2, %s3028_s29  }
 0x160   : > { %s3033_s19 = smov [#allocation25]   ;;  %s3034_s27 = smov [#allocation26]  }
 0x161   : > { %s587_s1 = sshll.u32 %s3033_s19, 4  ;;  %s601_s30 = sshll.u32 %s3034_s27, 4  ;;  %s588_s1 = int_to_ptr.vmem [resolvable:$true] %s587_s1  ;;  %s3448_s30 = int_to_ptr.vmem [resolvable:$true] %s601_s30 }
 0x162   : > { %s2783_s20 = scalar_lea.hbm %s3829_s14, 1024 }
 0x163   : > { %p2784_p7 = scmp.ne.s32.totalorder %s3829_s14, %s2783_s20  ;;  %p2790_p1 = scmp.lt.u32.totalorder %s2783_s20, %s3829_s14 }
 0x165   : > { %p2786_p9 = pnand %p2784_p7, %p3196_p8 }
 0x167   : > { %p2787_p4 = pneg %p2786_p9 }
 0x169   : > { %p2792_p3 = pnand %p2790_p1, %p2787_p4 }
 0x16b   : > { %2795 = shalt.err (!%p2792_p3)
}
 0x16c   : > { %s2796_s24 = scalar_lea.vmem %s588_s1, 1024  ;;  %p2804_p13 = scmp.lt.s32.totalorder %s588_s1, %s588_s1 }
 0x16d   : > { %p2797_p10 = scmp.ne.s32.totalorder %s588_s1, %s2796_s24  ;;  %p2805_p0 = scmp.lt.s32.totalorder %s2796_s24, %s2796_s24 }
 0x16f   : > { %p2799_p11 = pnand %p2797_p10, %p3196_p8  ;;  %p2806_p2 = por %p2805_p0, %p2804_p13 }
 0x171   : > { %p2800_p12 = pneg %p2799_p11 }
 0x173   : > { %p2807_p5 = pnand %p2806_p2, %p2800_p12 }
 0x175   : > { %2810 = shalt.err (!%p2807_p5)
}
 0x176   : > { %2286 = dma.hbm_to_vmem [thread:$0]  (!%p3180_p6), %s3829_s14, 1024, %s588_s1, [#allocation24], %s3027_s2, %s3027_s2, %s3028_s29  }
 0x177   : > { %s2811_s20 = scalar_lea.hbm %s3830_s15, 16 }
 0x178   : > { %p2812_p7 = scmp.ne.s32.totalorder %s3830_s15, %s2811_s20  ;;  %p2818_p1 = scmp.lt.u32.totalorder %s2811_s20, %s3830_s15 }
 0x17a   : > { %p2814_p9 = pnand %p2812_p7, %p3196_p8 }
 0x17c   : > { %p2815_p4 = pneg %p2814_p9 }
 0x17e   : > { %p2820_p3 = pnand %p2818_p1, %p2815_p4 }
 0x180   : > { %2823 = shalt.err (!%p2820_p3)
}
 0x181   : > { %s2824_s2 = scalar_lea.vmem %s3448_s30, 16  ;;  %s2831_s29 = scalar_lea.vmem %s3448_s30, 32 }
 0x182   : > { %p2825_p10 = scmp.ne.s32.totalorder %s3448_s30, %s2824_s2  ;;  %p2832_p13 = scmp.lt.s32.totalorder %s3448_s30, %s3448_s30 }
 0x183   : > { %p2833_p0 = scmp.lt.s32.totalorder %s2831_s29, %s2824_s2 }
 0x184   : > { %p2827_p11 = pnand %p2825_p10, %p3196_p8 }
 0x185   : > { %p2834_p2 = por %p2833_p0, %p2832_p13 }
 0x186   : > { %p2828_p12 = pneg %p2827_p11 }
 0x188   : > { %p2835_p5 = pnand %p2834_p2, %p2828_p12 }
 0x18a   : > { %2838 = shalt.err (!%p2835_p5)
}
 0x18b   : > { %s3873_s19 = sld [smem:[#allocation41_spill]]  ;;  %s3874_s0 = sld [smem:[#allocation40_spill]] }
 0x18c   : > { %s3875_s27 = sld [smem:[#allocation43_spill]]  ;;  %s1968_s21 = sadd.s32 4294967294, %s3017_s26  }
 0x18d   : > { %2289 = dma.hbm_to_vmem [thread:$0]  (!%p3180_p6), %s3830_s15, 16, %s3448_s30, [#allocation27]  }
 0x18e   : > { %s54_s16 = sadd.s32 1, %s3013_s25  ;;  %s61_s18 = sadd.s32 1, %s3005_s23 }
 0x18f   : > { %p56_p8 = scmp.ge.s32.totalorder %s54_s16, 2  ;;  %p69_p9 = scmp.eq.s32.totalorder %s3017_s26, 0 }
 0x190   : > { %p428_p13 = scmp.eq.s32.totalorder %s1968_s21, 1  ;;  %p2315_p2 = scmp.lt.s32.totalorder %s3017_s26, 2 }
 0x191   : > { %p68_p7 = scmp.ne.s32.totalorder %s3005_s23, %s3873_s19  ;;  %s3917_s16 = smov (%p56_p8, %s54_s16), 0 }
 0x192   : > { %p74_p1 = scmp.ne.s32.totalorder %s3873_s19, %s3874_s0  ;;  %s58_s30 = ssub.s32 %s3013_s25, %s3917_s16 }
 0x193   : > { %p3503_p4 = por %p69_p9, %p68_p7  ;;  %p422_p6 = scmp.eq.s32.totalorder %s3875_s27, 1 }
 0x194   : > { %p59_p3 = scmp.eq.s32.totalorder %s58_s30, 0  ;;  %p3877_p10 = scmp.eq.s32.totalorder %s3875_s27, 0 }
 0x195   : > { %p3518_p12 = por %p422_p6, %p68_p7  ;;  %p3525_p0 = por %p428_p13, %p74_p1 }
 0x196   : > { %p3514_p11 = por %p3877_p10, %p74_p1  ;;  %s612_s2 = sand.u32 1, %s3005_s23  }
 0x197   : > { %s3879_s22 = scalar_select %p3518_p12, 1, 0 }
 0x198   : > { %s3878_s3 = scalar_select %p3514_p11, 1, 0 }
 0x199   : > { %s3523_s17 = scalar_select %p59_p3, %s3005_s23, %s61_s18  }
 0x19a   : > { %s3880_s28 = scalar_select %p3525_p0, 1, 0 }
 0x19b   : > { %s1986_s29 = sshll.u32 %s3013_s25, 7  ;;  %s3532_s1 = sshll.u32 %s612_s2, 3 }
 0x19c   : > { %s3881_s0 = sld [smem:[#allocation45_spill]]  ;;  %s616_s21 = scalar_lea.vmem [#allocation2], %s3532_s1 }
 0x19d   : > { %s623_s18 = sshll.u32 %s616_s21, 4  ;;  %p3542_p5 = pnand %p2315_p2, %p3503_p4  ;;  %s3546_s18 = int_to_ptr.vmem [resolvable:$true] %s623_s18 }
 0x19e   : > { %s3883_s19 = sld [smem:[#allocation46_spill]]  ;;  %s613_s6 = scalar_lea.sflag [#allocation3], %s612_s2 }
 0x19f   : > { %p2841_p7 = pneg %p3542_p5 }
 0x1a2   : > { %s3537_s27 = scalar_lea.hbm %s3881_s0, %s1986_s29  ;;  %s2844_s8 = scalar_lea.hbm %s3881_s0, 256 }
 0x1a3   : > { %s2839_s7 = scalar_lea.hbm %s3537_s27, 128  ;;  %p2845_p1 = scmp.lt.u32.totalorder %s3537_s27, %s3881_s0 }
 0x1a4   : > { %s3551_s5 = scalar_lea.hbm %s3883_s19, %s1986_s29  ;;  %p2840_p8 = scmp.ne.s32.totalorder %s3537_s27, %s2839_s7 }
 0x1a5   : > { %p2846_p6 = scmp.lt.u32.totalorder %s2844_s8, %s2839_s7  ;;  %p2848_p10 = scmp.lt.u32.totalorder %s2839_s7, %s3537_s27 }
 0x1a6   : > { %p2842_p9 = pnand %p2841_p7, %p2840_p8 }
 0x1a7   : > { %p2847_p3 = por %p2846_p6, %p2845_p1 }
 0x1a8   : > { %p2843_p4 = pneg %p2842_p9 }
 0x1a9   : > { %p2849_p13 = por %p2848_p10, %p2847_p3 }
 0x1ab   : > { %p2850_p2 = pnand %p2849_p13, %p2843_p4 }
 0x1ad   : > { %2853 = shalt.err (!%p2850_p2)
}
 0x1ae   : > { %s2854_s4 = scalar_lea.vmem %s3546_s18, 128  ;;  %s3035_s2 = smov [#allocation2]  }
 0x1af   : > { %p2855_p8 = scmp.ne.s32.totalorder %s3546_s18, %s2854_s4  ;;  %s2859_s29 = sshll.u32 %s3035_s2, 4  ;;  %s2860_s29 = int_to_ptr.vmem [resolvable:$false] %s2859_s29 }
 0x1b0   : > { %s2861_s9 = scalar_lea.vmem %s2860_s29, 256  ;;  %p2862_p12 = scmp.lt.s32.totalorder %s3546_s18, %s2860_s29 }
 0x1b1   : > { %p2857_p9 = pnand %p2855_p8, %p2841_p7  ;;  %p2863_p1 = scmp.lt.s32.totalorder %s2861_s9, %s2854_s4 }
 0x1b3   : > { %p2858_p0 = pneg %p2857_p9  ;;  %p2864_p6 = por %p2863_p1, %p2862_p12 }
 0x1b5   : > { %p2865_p3 = pnand %p2864_p6, %p2858_p0 }
 0x1b7   : > { %2868 = shalt.err (!%p2865_p3)
}
 0x1b8   : > { %2293 = dma.hbm_to_vmem [thread:$0]  (!%p3542_p5), %s3537_s27, 128, %s3546_s18, %s613_s6  }
 0x1b9   : > { %s630_s7 = sand.u32 1, %s3017_s26   ;;  %s634_s8 = scalar_lea.vmem [#allocation5], %s3532_s1 }
 0x1ba   : > { %s642_s10 = sshll.u32 %s634_s8, 4  ;;  %s631_s24 = scalar_lea.sflag [#allocation6], %s630_s7  ;;  %s643_s10 = int_to_ptr.vmem [resolvable:$true] %s642_s10 }
 0x1bb   : > { %s2869_s20 = scalar_lea.hbm %s3551_s5, 128  ;;  %s2874_s2 = scalar_lea.hbm %s3883_s19, 256 }
 0x1bc   : > { %p2870_p12 = scmp.ne.s32.totalorder %s3551_s5, %s2869_s20  ;;  %p2875_p10 = scmp.lt.u32.totalorder %s3551_s5, %s3883_s19 }
 0x1bd   : > { %p2876_p13 = scmp.lt.u32.totalorder %s2874_s2, %s2869_s20  ;;  %p2878_p8 = scmp.lt.u32.totalorder %s2869_s20, %s3551_s5 }
 0x1be   : > { %p2872_p0 = pnand %p2870_p12, %p2841_p7 }
 0x1bf   : > { %p2877_p2 = por %p2876_p13, %p2875_p10 }
 0x1c0   : > { %p2873_p4 = pneg %p2872_p0 }
 0x1c1   : > { %p2879_p9 = por %p2878_p8, %p2877_p2 }
 0x1c3   : > { %p2880_p1 = pnand %p2879_p9, %p2873_p4 }
 0x1c5   : > { %2883 = shalt.err (!%p2880_p1)
}
 0x1c6   : > { %s2884_s6 = scalar_lea.vmem %s643_s10, 128  ;;  %s3036_s1 = smov [#allocation5]  }
 0x1c7   : > { %p2885_p6 = scmp.ne.s32.totalorder %s643_s10, %s2884_s6  ;;  %s2889_s27 = sshll.u32 %s3036_s1, 4  ;;  %s2890_s27 = int_to_ptr.vmem [resolvable:$false] %s2889_s27 }
 0x1c8   : > { %s2891_s18 = scalar_lea.vmem %s2890_s27, 256  ;;  %p2892_p0 = scmp.lt.s32.totalorder %s643_s10, %s2890_s27 }
 0x1c9   : > { %p2887_p3 = pnand %p2885_p6, %p2841_p7  ;;  %p2893_p11 = scmp.lt.s32.totalorder %s2891_s18, %s2884_s6 }
 0x1cb   : > { %p2888_p12 = pneg %p2887_p3  ;;  %p2894_p10 = por %p2893_p11, %p2892_p0 }
 0x1cd   : > { %p2895_p13 = pnand %p2894_p10, %p2888_p12 }
 0x1cf   : > { %2898 = shalt.err (!%p2895_p13)
}
 0x1d0   : > { %2296 = dma.hbm_to_vmem [thread:$0]  (!%p3542_p5), %s3551_s5, 128, %s643_s10, %s631_s24  }
 0x1d1   : > { %s3884_s7 = sld [smem:[#allocation44_spill]] }
 0x1d7   : > { %p3885_p4 = scmp.ne.s32.totalorder %s3884_s7, 0 }
 0x1d8   : > { %s3886_s8 = sld [smem:[#allocation41_spill]] (!%p3885_p4)  ;;  %p3887_p11 = scmp.ne.s32.totalorder (!%p3885_p4), %s3878_s3, 0 }
 0x1d9   : > { %651 = sbr.rel (%p3885_p4) target bundleno = 3087 (0xc0f), region = 84 }
 0x1de   : > { %s3602_s20 = sand.u32 (!%p3885_p4), 1, %s3886_s8  }
 0x1df   : > { %s3605_s21 = sshll.u32 (!%p3885_p4), %s3602_s20, 3  ;;  %s654_s4 = scalar_lea.sflag (!%p3885_p4), [#allocation3], %s3602_s20 }
 0x1e0   : > { %s657_s2 = scalar_lea.vmem [#allocation2], %s3605_s21 }
 0x1e1   : > { %2952 = dma.done.wait (%p3887_p11), %s654_s4, 128  }
 0x1e2   : > { %2954 = vsyncadd (%p3887_p11), %s654_s4, 4294967168  ;;  %s3888_s5 = sld [smem:[#allocation43_spill]]  ;;  %s666_s24 = scalar_lea.vmem [#allocation5], %s3605_s21 }
 0x1e8   : > { %s662_s30 = sand.u32 1, %s3888_s5  }
 0x1e9   : > { %s663_s10 = scalar_lea.sflag [#allocation6], %s662_s30 }
 0x1ea   : > { %2956 = dma.done.wait (%p3887_p11), %s663_s10, 128  }
 0x1eb   : > { %2958 = vsyncadd (%p3887_p11), %s663_s10, 4294967168  ;;  %p3889_p5 = scmp.eq.s32.totalorder %s3888_s5, 0 }
 0x1ed   : > { %2960 = dma.done.wait (%p3889_p5), [#allocation6], 16   ;;  %p3890_p7 = pmov %p3889_p5 }
 0x1ee   : > { %p3891_p2 = pmov %p3889_p5 }
 0x1ef   : > { %2962 = vsyncadd (%p3890_p7), [#allocation6], 4294967280 }
 0x1f0   : > { %2964 = dma.done.wait (%p3891_p2), [#allocation9], 272   ;;  %p3892_p8 = pmov %p3891_p2 }
 0x1f1   : > { %p3893_p9 = pmov %p3891_p2 }
 0x1f2   : > { %2966 = vsyncadd (%p3892_p8), [#allocation9], 4294967024 }
 0x1f3   : > { %2968 = dma.done.wait (%p3893_p9), [#allocation12], 272   ;;  %p3894_p1 = pmov %p3891_p2 }
 0x1f5   : > { %2970 = vsyncadd (%p3894_p1), [#allocation12], 4294967024  ;;  %p3895_p6 = pmov %p3894_p1 }
 0x1f6   : > { %p3896_p3 = pmov %p3894_p1 }
 0x1f7   : > { %2972 = dma.done.wait (%p3895_p6), [#allocation15], 272  }
 0x1f8   : > { %2974 = vsyncadd (%p3896_p3), [#allocation15], 4294967024  ;;  %p3897_p12 = pmov %p3894_p1 }
 0x1f9   : > { %p3898_p0 = pmov %p3894_p1 }
 0x1fa   : > { %2976 = dma.done.wait (%p3897_p12), [#allocation18], 32  }
 0x1fb   : > { %2978 = vsyncadd (%p3898_p0), [#allocation18], 4294967264  ;;  %p3899_p10 = pmov %p3898_p0 }
 0x1fc   : > { %p3900_p13 = pmov %p3898_p0 }
 0x1fd   : > { %2980 = dma.done.wait (%p3899_p10), [#allocation21], 272  }
 0x1fe   : > { %2982 = vsyncadd (%p3900_p13), [#allocation21], 4294967024  ;;  %p3901_p4 = pmov %p3898_p0 }
 0x1ff   : > { %p3902_p11 = pmov %p3898_p0 }
 0x200   : > { %2984 = dma.done.wait (%p3901_p4), [#allocation24], 1040  }
 0x201   : > { %2986 = vsyncadd (%p3902_p11), [#allocation24], 4294966256  ;;  %p3903_p5 = pmov %p3898_p0 }
 0x202   : > { %p3904_p7 = pmov %p3898_p0 }
 0x203   : > { %2988 = dma.done.wait (%p3903_p5), [#allocation27], 16  }
 0x204   : > { %2990 = vsyncadd (%p3904_p7), [#allocation27], 4294967280  ;;  %vm781_vm0 = vcmask 261120   ;;  %v777_v0 = vld [vmem:[%s657_s2] sm:$0xff]  ;;  %v3651_v1 = vld [vmem:[%s666_s24] sm:$0xff]  ;;  %v3037_v15 = vmov 0.0   ;;  %v962_v62 = vlaneseq }
 0x205   : > { %v782_v2 = vsel %vm781_vm0, %v777_v0, 0.0  ;;  %v811_v3 = vsel %vm781_vm0, %v3651_v1, 0.0  ;;  %v2407_v14 = vld [vmem:[#allocation13] sm:$0xff]   ;;  %2085 = vmatprep.subr.bf16.mxu1 %v3037_v15  ;;  %2113 = vmatprep.subr.bf16.mxu0 %v3037_v15  ;;  %v2408_v16 = vld [vmem:[#allocation13 + $0x8] sm:$0xff]   ;;  %vm3038_vm1 = vmmov 0   ;;  %v2410_v34 = vld [vmem:[#allocation10 + $0x8] sm:$0xff]  }
 0x206   : > { %783 = vadd.xlane.f32.xlu0 %v782_v2  ;;  %2086 = vmatpush3.bf16.msra.mxu1 %v2407_v14  ;;  %v2007_v24 = vld [vmem:[#allocation7] ss:$0 sm:$0xff]  ;;  %v2008_v26 = vld [vmem:[#allocation8] ss:$0 sm:$0xff]  ;;  %v2409_v31 = vld [vmem:[#allocation10] sm:$0xff]   ;;  %vm970_vm2 = vcmask 64512  }
 0x207   : > { %2087 = vmatprep.subr.bf16.mxu1 %v3037_v15  ;;  %2089 = vmatprep.mubr.msk.bf16.mxu1 %vm3038_vm1, %v3037_v15  ;;  %v2009_v37 = vld [vmem:[#allocation14] ss:$0 sm:$0xff]  ;;  %s3039_s3 = smov 120   ;;  %v2013_v45 = vld [vmem:[#allocation11] ss:$0 sm:$0xff]  ;;  %s3040_s29 = smov 104  }
 0x208   : > { %2115 = vmatprep.mubr.msk.bf16.mxu0 %vm3038_vm1, %v3037_v15  ;;  %s3041_s9 = smov 112   ;;  %v963_v63 = vshrl.u32 %v962_v62, 7  ;;  %s3042_s6 = smov 88   ;;  %vm1036_vm4 = vcmask 1043456   ;;  %vm1427_vm5 = vcmask 130048   ;;  %vm1429_vm6 = vcmask 195584  }
 0x209   : > { %s3043_s1 = smov 80   ;;  %s3044_s27 = smov 96  }
 0x20a   : > { %812 = vadd.xlane.f32.xlu0 %v811_v3  ;;  %2088 = vmatpush3.bf16.msra.mxu1 %v2408_v16  ;;  %s3045_s18 = smov 72   ;;  %s3046_s7 = smov 8  }
 0x20b   : > { %2093 = vmatprep.subr.bf16.mxu1 %v3037_v15  ;;  %s3047_s8 = smov 16   ;;  %s3048_s4 = smov 24  }
 0x20c   : > { %s3905_s2 = sld [smem:[#allocation42_spill]]  ;;  %s775_s30 = scalar_lea.vmem [#allocation28], %s3605_s21 }
 0x20d   : > { %s1731_s10 = sshll.u32 %s775_s30, 4  ;;  %p3907_p8 = scmp.ne.s32.totalorder %s3879_s22, 0  ;;  %s3767_s10 = int_to_ptr.vmem [resolvable:$true] %s1731_s10 }
 0x20e   : > { %s3049_s21 = smov [#allocation28]  }
 0x212   : > { %s2045_s5 = sshll.u32 %s3905_s2, 7 }
 0x293   : > { %v784_v4 = vpop.xlane.xlu0 %783 }
 0x294   : > { %v786_v5 = vmul.f32 0.03125, %v784_v4 }
 0x296   : > { %v787_v6 = vsub.f32 %v777_v0, %v786_v5  ;;  %v968_v0 = vand.u32 127, %v962_v62 }
 0x297   : > { %v813_v7 = vpop.xlane.xlu0 %812 }
 0x298   : > { %v814_v8 = vmul.f32 0.03125, %v813_v7  ;;  %v788_v9 = vmul.f32 %v787_v6, %v787_v6  ;;  %vm969_vm3 = vcmp.ge.s32.totalorder %v963_v63, %v968_v0 }
 0x29a   : > { %v815_v10 = vsub.f32 %v3651_v1, %v814_v8  ;;  %v789_v11 = vsel %vm781_vm0, %v788_v9, 0.0 }
 0x29b   : > { %790 = vadd.xlane.f32.xlu1 %v789_v11 }
 0x29c   : > { %v816_v12 = vmul.f32 %v815_v10, %v815_v10 }
 0x29e   : > { %v817_v13 = vsel %vm781_vm0, %v816_v12, 0.0 }
 0x29f   : > { %818 = vadd.xlane.f32.xlu1 %v817_v13 }
 0x328   : > { %v791_v17 = vpop.xlane.xlu1 %790 }
 0x329   : > { %v792_v18 = vmul.f32 0.03125, %v791_v17 }
 0x32b   : > { %v793_v19 = vadd.f32 1e-05, %v792_v18 }
 0x32c   : > { %v819_v20 = vpop.xlane.xlu1 %818 }
 0x32d   : > { %2423 = vrsqrt.f32 %v793_v19  ;;  %v820_v21 = vmul.f32 0.03125, %v819_v20 }
 0x32f   : > { %v821_v22 = vadd.f32 1e-05, %v820_v21 }
 0x331   : > { %2425 = vrsqrt.f32 %v821_v22 }
 0x337   : > { %v2424_v23 = vpop.eup %2423 }
 0x338   : > { %v795_v25 = vmul.f32 %v2424_v23, %v787_v6 }
 0x33a   : > { %v802_v27 = vmul.f32 %v2007_v24, %v795_v25 }
 0x33b   : > { %v2426_v28 = vpop.eup %2425 }
 0x33c   : > { %v823_v29 = vmul.f32 %v2426_v28, %v815_v10  ;;  %v809_v30 = vadd.f32 %v2008_v26, %v802_v27 }
 0x33e   : > { %v810_v32 = vpack.c.bf16 %v809_v30, %v809_v30  ;;  %v824_v33 = vmul.f32 %v2007_v24, %v823_v29 }
 0x340   : > { %2090 = vmatmul.mubr.msk.bf16.vlgmr.msra.gmra.mrb[0].mxu1 %vm781_vm0, %v810_v32  ;;  %v825_v35 = vadd.f32 %v2008_v26, %v824_v33 }
 0x341   : > { %2094 = vmatpush3.bf16.msra.mxu1 %v2409_v31  ;;  %2097 = vmatprep.mubr.msk.bf16.mxu1 %vm3038_vm1, %v3037_v15 }
 0x342   : > { %2095 = vmatprep.subr.bf16.mxu1 %v3037_v15  ;;  %v826_v36 = vpack.c.bf16 %v825_v35, %v825_v35 }
 0x345   : > { %2096 = vmatpush3.bf16.msra.mxu1 %v2410_v34 }
 0x346   : > { %2101 = vmatprep.subr.bf16.mxu1 %v3037_v15 }
 0x348   : > { %2098 = vmatmul.mubr.msk.bf16.vlgmr.msra.gmra.mrb[4].mxu1 %vm781_vm0, %v826_v36 }
 0x349   : > { %2103 = vmatprep.mubr.msk.bf16.mxu1 %vm3038_vm1, %v3037_v15 }
 0x413   : > { %v887_v38 = vpop.f32.mrb[0].mxu1 }
 0x414   : > { %v888_v39 = vadd.f32 %v2009_v37, %v887_v38  ;;  %v2091_v40 = vpop.f32.mrb[1].mxu1 }
 0x415   : > { %v890_v41 = vpop.f32.mrb[2].mxu1 }
 0x416   : > { %v3675_v42 = vpack.c.bf16 %v888_v39, %v888_v39  ;;  %v2092_v43 = vpop.f32.mrb[3].mxu1 }
 0x418   : > { %1083 = vrot.lane.b32.xlu0 %v3675_v42, %s3039_s3  ;;  %v975_v44 = vsel %vm970_vm2, %v3675_v42, 0 }
 0x419   : > { %2102 = vmatpush3.bf16.xpose.msra.mxu1 %v975_v44 }
 0x41a   : > { %2107 = vmatprep.subr.bf16.mxu1 %v3037_v15 }
 0x41b   : > { %v953_v46 = vpop.f32.mrb[4].mxu1 }
 0x41c   : > { %v954_v47 = vadd.f32 %v2013_v45, %v953_v46  ;;  %1305 = vrot.lane.b32.xlu0 %v3675_v42, %s3040_s29  ;;  %v2099_v48 = vpop.f32.mrb[5].mxu1 }
 0x41d   : > { %v956_v49 = vpop.f32.mrb[6].mxu1 }
 0x41e   : > { %v959_v50 = vmul.f32 0.35355338, %v954_v47  ;;  %v2100_v51 = vpop.f32.mrb[7].mxu1 }
 0x420   : > { %v960_v52 = vpack.c.bf16 %v959_v50, %v959_v50 }
 0x422   : > { %1081 = vrot.lane.b32.xlu1 %v960_v52, %s3039_s3  ;;  %2104 = vmatmul.mubr.msk.bf16.vlgmr.msra.gmra.mrb[8].mxu1 %vm970_vm2, %v960_v52 }
 0x423   : > { %2109 = vmatprep.mubr.msk.bf16.mxu1 %vm3038_vm1, %v3037_v15 }
 0x426   : > { %1194 = vrot.lane.b32.xlu1 %v3675_v42, %s3041_s9 }
 0x42a   : > { %1192 = vrot.lane.b32.xlu1 %v960_v52, %s3041_s9 }
 0x42e   : > { %1303 = vrot.lane.b32.xlu1 %v960_v52, %s3040_s29  ;;  %s3906_s29 = sld [smem:[#allocation56_spill]] }
 0x434   : > { %s3765_s9 = scalar_lea.hbm %s3906_s29, %s2045_s5 }
 0x48a   : > { %v1084_v53 = vpop.permute.xlu0 %1083 }
 0x48b   : > { %v1089_v54 = vsel %vm970_vm2, %v1084_v53, 0 }
 0x48c   : > { %2114 = vmatpush3.bf16.xpose.msra.mxu0 %v1089_v54 }
 0x48d   : > { %2125 = vmatprep.subr.bf16.mxu0 %v3037_v15 }
 0x48e   : > { %v1306_v58 = vpop.permute.xlu0 %1305 }
 0x48f   : > { %v1311_v60 = vsel %vm970_vm2, %v1306_v58, 0 }
 0x494   : > { %v1082_v55 = vpop.permute.xlu1 %1081 }
 0x495   : > { %2116 = vmatmul.mubr.msk.bf16.vlgmr.msra.gmra.mrb[0].mxu0 %vm970_vm2, %v1082_v55 }
 0x496   : > { %2127 = vmatprep.mubr.msk.bf16.mxu0 %vm3038_vm1, %v3037_v15 }
 0x498   : > { %v1195_v56 = vpop.permute.xlu1 %1194 }
 0x499   : > { %v1200_v57 = vsel %vm970_vm2, %v1195_v56, 0 }
 0x49a   : > { %2126 = vmatpush3.bf16.xpose.msra.mxu0 %v1200_v57 }
 0x49b   : > { %2137 = vmatprep.subr.bf16.mxu0 %v3037_v15 }
 0x49c   : > { %v1193_v59 = vpop.permute.xlu1 %1192 }
 0x4a0   : > { %v1304_v61 = vpop.permute.xlu1 %1303 }
 0x4a1   : > { %2128 = vmatmul.mubr.msk.bf16.vlgmr.msra.gmra.mrb[4].mxu0 %vm970_vm2, %v1193_v59 }
 0x4a2   : > { %2138 = vmatpush3.bf16.xpose.msra.mxu0 %v1311_v60  ;;  %2139 = vmatprep.mubr.msk.bf16.mxu0 %vm3038_vm1, %v3037_v15 }
 0x4a3   : > { %2149 = vmatprep.subr.bf16.mxu0 %v3037_v15 }
 0x4a9   : > { %2140 = vmatmul.mubr.msk.bf16.vlgmr.msra.gmra.mrb[8].mxu0 %vm970_vm2, %v1304_v61 }
 0x4aa   : > { %2153 = vmatprep.mubr.msk.bf16.mxu0 %vm3038_vm1, %v3037_v15 }
 0x4f5   : > { %v1011_v2 = vpop.f32.mrb[8].mxu1 }
 0x4f6   : > { %v1017_v3 = vsel %vm969_vm3, %v1011_v2, -1e+09  ;;  %v2105_v4 = vpop.f32.mrb[9].mxu1 }
 0x4f7   : > { %v1014_v5 = vpop.f32.mrb[10].mxu1  ;;  %v1018_v6 = vsel %vm970_vm2, %v1017_v3, -inf }
 0x4f8   : > { %1019 = vmax.xlane.f32.xlu0 %v1018_v6  ;;  %v2106_v7 = vpop.f32.mrb[11].mxu1 }
 0x568   : > { %v1125_v8 = vpop.f32.mrb[0].mxu0 }
 0x569   : > { %v1131_v9 = vsel %vm969_vm3, %v1125_v8, -1e+09  ;;  %v2117_v10 = vpop.f32.mrb[1].mxu0 }
 0x56a   : > { %v1128_v11 = vpop.f32.mrb[2].mxu0  ;;  %v1132_v12 = vsel %vm970_vm2, %v1131_v9, -inf }
 0x56b   : > { %1133 = vmax.xlane.f32.xlu1 %v1132_v12  ;;  %v2118_v13 = vpop.f32.mrb[3].mxu0  ;;  %v2411_v12 = vld [vmem:[#allocation16] sm:$0xff]  }
 0x56c   : > { %2150 = vmatpush3.bf16.msra.mxu0 %v2411_v12  ;;  %v2412_v13 = vld [vmem:[#allocation16 + $0x8] sm:$0xff]  }
 0x56d   : > { %2151 = vmatprep.subr.bf16.mxu0 %v3037_v15 }
 0x570   : > { %2152 = vmatpush3.bf16.msra.mxu0 %v2412_v13 }
 0x571   : > { %2165 = vmatprep.subr.bf16.mxu0 %v3037_v15 }
 0x574   : > { %v1236_v14 = vpop.f32.mrb[4].mxu0 }
 0x575   : > { %v1242_v16 = vsel %vm969_vm3, %v1236_v14, -1e+09  ;;  %v2129_v17 = vpop.f32.mrb[5].mxu0 }
 0x576   : > { %v1239_v18 = vpop.f32.mrb[6].mxu0  ;;  %v1243_v19 = vsel %vm970_vm2, %v1242_v16, -inf }
 0x577   : > { %1244 = vmax.xlane.f32.xlu0 %v1243_v19  ;;  %v2130_v20 = vpop.f32.mrb[7].mxu0 }
 0x57c   : > { %v1347_v21 = vpop.f32.mrb[8].mxu0 }
 0x57d   : > { %v1353_v22 = vsel %vm969_vm3, %v1347_v21, -1e+09  ;;  %v2141_v23 = vpop.f32.mrb[9].mxu0 }
 0x57e   : > { %v1350_v24 = vpop.f32.mrb[10].mxu0  ;;  %v1354_v25 = vsel %vm970_vm2, %v1353_v22, -inf }
 0x57f   : > { %1355 = vmax.xlane.f32.xlu0 %v1354_v25  ;;  %v2142_v26 = vpop.f32.mrb[11].mxu0 }
 0x585   : > { %v1020_v27 = vpop.xlane.xlu0 %1019 }
 0x586   : > { %v1021_v28 = vsub.f32 %v1017_v3, %v1020_v27 }
 0x588   : > { %v1022_v29 = vmul.f32 1.442695, %v1021_v28 }
 0x58a   : > { %2427 = vpow2.f32 %v1022_v29 }
 0x594   : > { %v2428_v30 = vpop.eup %2427 }
 0x595   : > { %v1024_v31 = vsel %vm970_vm2, %v2428_v30, 0.0 }
 0x596   : > { %1025 = vadd.xlane.f32.xlu0 %v1024_v31 }
 0x5f8   : > { %v1134_v32 = vpop.xlane.xlu1 %1133 }
 0x5f9   : > { %v1135_v33 = vsub.f32 %v1131_v9, %v1134_v32 }
 0x5fb   : > { %v1136_v34 = vmul.f32 1.442695, %v1135_v33 }
 0x5fd   : > { %2429 = vpow2.f32 %v1136_v34  ;;  %v2025_v34 = vld [vmem:[#allocation17] ss:$0 sm:$0xff] }
 0x604   : > { %v1245_v35 = vpop.xlane.xlu0 %1244 }
 0x605   : > { %v1246_v36 = vsub.f32 %v1242_v16, %v1245_v35 }
 0x607   : > { %v2430_v37 = vpop.eup %2429  ;;  %v1247_v38 = vmul.f32 1.442695, %v1246_v36 }
 0x608   : > { %v1138_v39 = vsel %vm970_vm2, %v2430_v37, 0.0 }
 0x609   : > { %2431 = vpow2.f32 %v1247_v38  ;;  %1139 = vadd.xlane.f32.xlu1 %v1138_v39 }
 0x60c   : > { %v1356_v43 = vpop.xlane.xlu0 %1355 }
 0x60d   : > { %v1357_v44 = vsub.f32 %v1353_v22, %v1356_v43 }
 0x60f   : > { %v1358_v45 = vmul.f32 1.442695, %v1357_v44 }
 0x611   : > { %2433 = vpow2.f32 %v1358_v45 }
 0x613   : > { %v2432_v40 = vpop.eup %2431 }
 0x614   : > { %v1249_v41 = vsel %vm970_vm2, %v2432_v40, 0.0 }
 0x615   : > { %1250 = vadd.xlane.f32.xlu0 %v1249_v41 }
 0x61a   : > { %1144 = vrot.lane.b32.xlu1 %v3675_v42, %s3042_s6  ;;  %s1717_s6 = scalar_lea.sflag [#allocation4], %s3602_s20 }
 0x61b   : > { %v2434_v46 = vpop.eup %2433 }
 0x61c   : > { %v1360_v47 = vsel %vm970_vm2, %v2434_v46, 0.0 }
 0x61e   : > { %1255 = vrot.lane.b32.xlu1 %v3675_v42, %s3043_s1  ;;  %s2899_s1 = scalar_lea.vmem %s3767_s10, 128 }
 0x61f   : > { %p2900_p2 = scmp.ne.s32.totalorder %s3767_s10, %s2899_s1 }
 0x621   : > { %p2901_p9 = pnand %p2900_p2, %p3907_p8 }
 0x623   : > { %v1026_v48 = vpop.xlane.xlu0 %1025  ;;  %p2902_p1 = pneg %p2901_p9 }
 0x624   : > { %2435 = vrcp.f32 %v1026_v48 }
 0x62b   : > { %1031 = vrot.lane.b32.xlu0 %v3675_v42, %s3044_s27  ;;  %s2903_s27 = sshll.u32 %s3049_s21, 4  ;;  %s2904_s27 = int_to_ptr.vmem [resolvable:$false] %s2903_s27 }
 0x62c   : > { %p2906_p6 = scmp.lt.s32.totalorder %s3767_s10, %s2904_s27 }
 0x62e   : > { %v2436_v50 = vpop.eup %2435 }
 0x62f   : > { %v1028_v52 = vmul.f32 %v2436_v50, %v2428_v30  ;;  %v2414_v50 = vld [vmem:[#allocation22 + $0x8] sm:$0xff]  }
 0x631   : > { %v1029_v56 = vpack.c.bf16 %v1028_v52, %v1028_v52  ;;  %v2417_v52 = vld [vmem:[#allocation25 + $0x10] sm:$0xff]  }
 0x642   : > { %1361 = vadd.xlane.f32.xlu1 %v1360_v47 }
 0x653   : > { %1366 = vrot.lane.b32.xlu1 %v3675_v42, %s3045_s18  ;;  %s2905_s18 = scalar_lea.vmem %s2904_s27, 256 }
 0x654   : > { %p2907_p3 = scmp.lt.s32.totalorder %s2905_s18, %s2899_s1 }
 0x656   : > { %p2908_p12 = por %p2907_p3, %p2906_p6 }
 0x658   : > { %p2909_p0 = pnand %p2908_p12, %p2902_p1 }
 0x696   : > { %v1140_v49 = vpop.xlane.xlu1 %1139 }
 0x697   : > { %2437 = vrcp.f32 %v1140_v49  ;;  %v2413_v49 = vld [vmem:[#allocation22] sm:$0xff]  }
 0x69a   : > { %v1145_v55 = vpop.permute.xlu1 %1144 }
 0x69b   : > { %v1150_v42 = vsel %vm1036_vm4, %v1145_v55, 0 }
 0x69e   : > { %v1256_v59 = vpop.permute.xlu1 %1255 }
 0x69f   : > { %v1261_v62 = vsel %vm1036_vm4, %v1256_v59, 0 }
 0x6a1   : > { %v2438_v57 = vpop.eup %2437 }
 0x6a2   : > { %v1251_v51 = vpop.xlane.xlu0 %1250  ;;  %v1142_v58 = vmul.f32 %v2438_v57, %v2430_v37  ;;  %v2029_v57 = vld [vmem:[#allocation19] ss:$0 sm:$0xff] }
 0x6a3   : > { %2439 = vrcp.f32 %v1251_v51  ;;  %v2416_v51 = vld [vmem:[#allocation25 + $0x8] sm:$0xff]  }
 0x6a4   : > { %v1143_v60 = vpack.c.bf16 %v1142_v58, %v1142_v58  ;;  %v2030_v58 = vld [vmem:[#allocation20] ss:$0 sm:$0xff] }
 0x6a6   : > { %v1032_v53 = vpop.permute.xlu0 %1031 }
 0x6a7   : > { %v1038_v54 = vsel %vm1036_vm4, %v1032_v53, 0 }
 0x6a8   : > { %2108 = vmatpush3.bf16.msra.mxu1 %v1038_v54 }
 0x6a9   : > { %2119 = vmatprep.subr.bf16.mxu1 %v3037_v15 }
 0x6ab   : > { %2110 = vmatmul.mubr.msk.bf16.vlgmr.msra.gmra.mrb[12].mxu1 %vm970_vm2, %v1029_v56 }
 0x6ac   : > { %2120 = vmatpush3.bf16.msra.mxu1 %v1150_v42  ;;  %2121 = vmatprep.mubr.msk.bf16.mxu1 %vm3038_vm1, %v3037_v15 }
 0x6ad   : > { %2131 = vmatprep.subr.bf16.mxu1 %v3037_v15  ;;  %v2440_v61 = vpop.eup %2439 }
 0x6ae   : > { %v1253_v63 = vmul.f32 %v2440_v61, %v2432_v40 }
 0x6b0   : > { %v1254_v0 = vpack.c.bf16 %v1253_v63, %v1253_v63  ;;  %v2419_v63 = vld [vmem:[#allocation25 + $0x20] sm:$0xff]  }
 0x6b3   : > { %2122 = vmatmul.mubr.msk.bf16.vlgmr.msra.gmra.mrb[16].mxu1 %vm970_vm2, %v1143_v60 }
 0x6b4   : > { %2132 = vmatpush3.bf16.msra.mxu1 %v1261_v62  ;;  %2133 = vmatprep.mubr.msk.bf16.mxu1 %vm3038_vm1, %v3037_v15  ;;  %v2418_v62 = vld [vmem:[#allocation25 + $0x18] sm:$0xff]  }
 0x6b5   : > { %2143 = vmatprep.subr.bf16.mxu1 %v3037_v15 }
 0x6bb   : > { %2134 = vmatmul.mubr.msk.bf16.vlgmr.msra.gmra.mrb[20].mxu1 %vm970_vm2, %v1254_v0  ;;  %v2420_v0 = vld [vmem:[#allocation25 + $0x28] sm:$0xff]  }
 0x6bc   : > { %2145 = vmatprep.mubr.msk.bf16.mxu1 %vm3038_vm1, %v3037_v15 }
 0x6cf   : > { %v1362_v2 = vpop.xlane.xlu1 %1361 }
 0x6d0   : > { %2441 = vrcp.f32 %v1362_v2  ;;  %v2421_v2 = vld [vmem:[#allocation25 + $0x30] sm:$0xff]  }
 0x6d3   : > { %v1367_v3 = vpop.permute.xlu1 %1366 }
 0x6d4   : > { %v1372_v4 = vsel %vm1036_vm4, %v1367_v3, 0  ;;  %v2422_v3 = vld [vmem:[#allocation25 + $0x38] sm:$0xff]  }
 0x6d5   : > { %2144 = vmatpush3.bf16.msra.mxu1 %v1372_v4  ;;  %v2031_v4 = vld [vmem:[#allocation23] ss:$0 sm:$0xff] }
 0x6d6   : > { %2157 = vmatprep.subr.bf16.mxu1 %v3037_v15 }
 0x6da   : > { %v2442_v5 = vpop.eup %2441 }
 0x6db   : > { %v1364_v6 = vmul.f32 %v2442_v5, %v2434_v46 }
 0x6dd   : > { %v1365_v7 = vpack.c.bf16 %v1364_v6, %v1364_v6 }
 0x6df   : > { %2146 = vmatmul.mubr.msk.bf16.vlgmr.msra.gmra.mrb[24].mxu1 %vm970_vm2, %v1365_v7 }
 0x6e0   : > { %2161 = vmatprep.mubr.msk.bf16.mxu1 %vm3038_vm1, %v3037_v15  ;;  %2158 = vmatpush3.bf16.msra.mxu1 %v2413_v49 }
 0x6e1   : > { %2159 = vmatprep.subr.bf16.mxu1 %v3037_v15 }
 0x6e4   : > { %2160 = vmatpush3.bf16.msra.mxu1 %v2414_v50 }
 0x77e   : > { %v1074_v8 = vpop.f32.mrb[12].mxu1 }
 0x77f   : > { %v2111_v9 = vpop.f32.mrb[13].mxu1 }
 0x780   : > { %v1077_v10 = vpop.f32.mrb[14].mxu1 }
 0x781   : > { %v2112_v11 = vpop.f32.mrb[15].mxu1 }
 0x786   : > { %v1186_v14 = vpop.f32.mrb[16].mxu1 }
 0x787   : > { %1415 = vrot.lane.b32.xlu0 %v1186_v14, %s3046_s7  ;;  %v2123_v16 = vpop.f32.mrb[17].mxu1 }
 0x788   : > { %v1189_v17 = vpop.f32.mrb[18].mxu1 }
 0x789   : > { %v2124_v18 = vpop.f32.mrb[19].mxu1 }
 0x78e   : > { %v1297_v19 = vpop.f32.mrb[20].mxu1 }
 0x78f   : > { %1419 = vrot.lane.b32.xlu1 %v1297_v19, %s3047_s8  ;;  %v2135_v20 = vpop.f32.mrb[21].mxu1 }
 0x790   : > { %v1300_v21 = vpop.f32.mrb[22].mxu1 }
 0x791   : > { %v2136_v22 = vpop.f32.mrb[23].mxu1 }
 0x7b2   : > { %v1408_v23 = vpop.f32.mrb[24].mxu1 }
 0x7b3   : > { %1423 = vrot.lane.b32.xlu0 %v1408_v23, %s3048_s4  ;;  %v2147_v24 = vpop.f32.mrb[25].mxu1 }
 0x7b4   : > { %v1411_v25 = vpop.f32.mrb[26].mxu1 }
 0x7b5   : > { %v2148_v26 = vpop.f32.mrb[27].mxu1 }
 0x7f9   : > { %v1416_v27 = vpop.permute.xlu0 %1415 }
 0x7fa   : > { %v1426_v29 = vsel %vm970_vm2, %v1074_v8, %v1416_v27 }
 0x801   : > { %v1420_v28 = vpop.permute.xlu1 %1419 }
 0x802   : > { %v1428_v30 = vsel %vm1427_vm5, %v1426_v29, %v1420_v28 }
 0x825   : > { %v1424_v31 = vpop.permute.xlu0 %1423 }
 0x826   : > { %v1430_v32 = vsel %vm1429_vm6, %v1428_v30, %v1424_v31 }
 0x827   : > { %v1431_v33 = vpack.c.bf16 %v1430_v32, %v1430_v32 }
 0x829   : > { %2154 = vmatmul.mubr.msk.bf16.vlgmr.msra.gmra.mrb[12].mxu0 %vm781_vm0, %v1431_v33 }
 0x82a   : > { %2181 = vmatprep.mubr.msk.bf16.mxu0 %vm3038_vm1, %v3037_v15 }
 0x8fc   : > { %v1492_v35 = vpop.f32.mrb[12].mxu0 }
 0x8fd   : > { %v1493_v36 = vadd.f32 %v2025_v34, %v1492_v35  ;;  %v2155_v37 = vpop.f32.mrb[13].mxu0 }
 0x8fe   : > { %v1495_v38 = vpop.f32.mrb[14].mxu0 }
 0x8ff   : > { %v1498_v39 = vmul.f32 0.70710677, %v1493_v36  ;;  %v2156_v40 = vpop.f32.mrb[15].mxu0 }
 0x901   : > { %v3744_v41 = vadd.f32 %v1498_v39, %v3651_v1  ;;  %v2415_v1 = vld [vmem:[#allocation25] sm:$0xff]  }
 0x902   : > { %2166 = vmatpush3.bf16.msra.mxu0 %v2415_v1 }
 0x903   : > { %v1502_v43 = vsel %vm781_vm0, %v3744_v41, 0.0  ;;  %2167 = vmatprep.subr.bf16.mxu0 %v3037_v15 }
 0x904   : > { %1503 = vadd.xlane.f32.xlu1 %v1502_v43 }
 0x906   : > { %2168 = vmatpush3.bf16.msra.mxu0 %v2416_v51 }
 0x907   : > { %2169 = vmatprep.subr.bf16.mxu0 %v3037_v15 }
 0x90a   : > { %2170 = vmatpush3.bf16.msra.mxu0 %v2417_v52 }
 0x90b   : > { %2171 = vmatprep.subr.bf16.mxu0 %v3037_v15 }
 0x90e   : > { %2172 = vmatpush3.bf16.msra.mxu0 %v2418_v62 }
 0x90f   : > { %2173 = vmatprep.subr.bf16.mxu0 %v3037_v15 }
 0x912   : > { %2174 = vmatpush3.bf16.msra.mxu0 %v2419_v63 }
 0x913   : > { %2175 = vmatprep.subr.bf16.mxu0 %v3037_v15 }
 0x916   : > { %2176 = vmatpush3.bf16.msra.mxu0 %v2420_v0 }
 0x917   : > { %2177 = vmatprep.subr.bf16.mxu0 %v3037_v15 }
 0x91a   : > { %2178 = vmatpush3.bf16.msra.mxu0 %v2421_v2 }
 0x91b   : > { %2179 = vmatprep.subr.bf16.mxu0 %v3037_v15  ;;  %v2035_v15 = vld [vmem:[#allocation26] ss:$0 sm:$0xff] }
 0x91e   : > { %2180 = vmatpush3.bf16.msra.mxu0 %v2422_v3 }
 0x991   : > { %v1504_v44 = vpop.xlane.xlu1 %1503 }
 0x992   : > { %v1505_v45 = vmul.f32 0.03125, %v1504_v44 }
 0x994   : > { %v1506_v46 = vsub.f32 %v3744_v41, %v1505_v45 }
 0x996   : > { %v1507_v47 = vmul.f32 %v1506_v46, %v1506_v46 }
 0x998   : > { %v1508_v48 = vsel %vm781_vm0, %v1507_v47, 0.0 }
 0x999   : > { %1509 = vadd.xlane.f32.xlu0 %v1508_v48 }
 0xa26   : > { %v1510_v53 = vpop.xlane.xlu0 %1509 }
 0xa27   : > { %v1511_v54 = vmul.f32 0.03125, %v1510_v53 }
 0xa29   : > { %v1512_v55 = vadd.f32 1e-05, %v1511_v54 }
 0xa2b   : > { %2443 = vrsqrt.f32 %v1512_v55 }
 0xa35   : > { %v2444_v56 = vpop.eup %2443 }
 0xa36   : > { %v1514_v42 = vmul.f32 %v2444_v56, %v1506_v46 }
 0xa38   : > { %v1521_v59 = vmul.f32 %v2029_v57, %v1514_v42 }
 0xa3a   : > { %v1528_v60 = vadd.f32 %v2030_v58, %v1521_v59 }
 0xa3c   : > { %v1529_v61 = vpack.c.bf16 %v1528_v60, %v1528_v60 }
 0xa3e   : > { %2162 = vmatmul.mubr.msk.bf16.vlgmr.msra.gmra.mrb[28].mxu1 %vm781_vm0, %v1529_v61 }
 0xb11   : > { %v1590_v5 = vpop.f32.mrb[28].mxu1 }
 0xb12   : > { %v1591_v6 = vadd.f32 %v2031_v4, %v1590_v5  ;;  %v2163_v7 = vpop.f32.mrb[29].mxu1 }
 0xb13   : > { %v1593_v8 = vpop.f32.mrb[30].mxu1 }
 0xb14   : > { %v1597_v9 = vmul.f32 0.70710677, %v1591_v6  ;;  %v2164_v10 = vpop.f32.mrb[31].mxu1  ;;  %v1596_v12 = vmul.f32 0.5, %v1591_v6 }
 0xb16   : > { %2445 = verf.f32 %v1597_v9 }
 0xb20   : > { %v2446_v11 = vpop.eup %2445 }
 0xb21   : > { %v1599_v13 = vadd.f32 1.0, %v2446_v11 }
 0xb23   : > { %v1600_v14 = vmul.f32 %v1599_v13, %v1596_v12 }
 0xb25   : > { %v1601_v16 = vpack.c.bf16 %v1600_v14, %v1600_v14 }
 0xb27   : > { %2182 = vmatmul.mubr.bf16.vlgmr.msra.gmra.mrb[16].mxu0 %v1601_v16 }
 0xbfa   : > { %v1707_v17 = vpop.f32.mrb[16].mxu0 }
 0xbfb   : > { %v1708_v18 = vadd.f32 %v2035_v15, %v1707_v17  ;;  %v2183_v19 = vpop.f32.mrb[17].mxu0 }
 0xbfc   : > { %v1710_v20 = vpop.f32.mrb[18].mxu0 }
 0xbfd   : > { %v1713_v21 = vmul.f32 0.70710677, %v1708_v18  ;;  %v2184_v22 = vpop.f32.mrb[19].mxu0 }
 0xbff   : > { %v1714_v23 = vadd.f32 %v1713_v21, %v3744_v41 }
 0xc01   : > { %1715 = vst.msk [vmem:[%s775_s30] sm:$0xff] %vm781_vm0, %v1714_v23 }
 0xc02   : > { %2912 = shalt.err (!%p2909_p0)
}
 0xc03   : > { %s2913_s20 = scalar_lea.hbm %s3765_s9, 128  ;;  %s2917_s4 = scalar_lea.hbm %s3906_s29, 256 }
 0xc04   : > { %p2914_p10 = scmp.ne.s32.totalorder %s3765_s9, %s2913_s20  ;;  %p2918_p11 = scmp.lt.u32.totalorder %s3765_s9, %s3906_s29 }
 0xc05   : > { %p2919_p5 = scmp.lt.u32.totalorder %s2917_s4, %s2913_s20  ;;  %p2921_p2 = scmp.lt.u32.totalorder %s2913_s20, %s3765_s9 }
 0xc06   : > { %p2915_p13 = pnand %p2914_p10, %p3907_p8 }
 0xc07   : > { %p2920_p7 = por %p2919_p5, %p2918_p11 }
 0xc08   : > { %p2916_p4 = pneg %p2915_p13 }
 0xc09   : > { %p2922_p9 = por %p2921_p2, %p2920_p7 }
 0xc0b   : > { %p2923_p1 = pnand %p2922_p9, %p2916_p4 }
 0xc0d   : > { %2926 = shalt.err (!%p2923_p1)
}
 0xc0e   : > { %2245 = dma.vmem_to_hbm [thread:$0]  (%p3907_p8), %s3767_s10, 128, %s3765_s9, %s1717_s6  }
 0xc0f PF: > { %s3908_s30 = sld [smem:[#allocation40_spill]]  ;;  %p3909_p6 = scmp.ne.s32.totalorder %s3880_s28, 0 }
 0xc10   : > { %p3910_p3 = scmp.ge.s32.totalorder %s3017_s26, 2 }
 0xc12   : > { %p2298_p12 = pnand %p3910_p3, %p3909_p6 }
 0xc15   : > { %s1743_s24 = sand.u32 1, %s3908_s30  }
 0xc16   : > { %s1744_s3 = scalar_lea.sflag [#allocation4], %s1743_s24 }
 0xc17   : > { %2992 = dma.done.wait (!%p2298_p12), %s1744_s3, 128  }
 0xc18   : > { %2994 = vsyncadd (!%p2298_p12), %s1744_s3, 4294967168  ;;  %s42_s26 = sadd.s32 1, %s3017_s26   ;;  %s3911_s21 = sld [smem:[#allocation41_spill]] }
 0xc19   : > { %p39_p0 = scmp.ge.s32.totalorder %s42_s26, 4   ;;  %s3912_s22 = smov %s3005_s23 }
 0xc1a   : > { %s3913_s23 = smov %s3523_s17  ;;  %s3914_s24 = smov %s3013_s25 }
 0xc1b   : > { %s3915_s25 = smov %s3917_s16  ;;  %41 = sbr.rel (!%p39_p0) target bundleno = 28 (0x1c), region = 198 }
 0xc22   :  { %1749 = vsyncpa [#allocation3], 1 }
 0xc23   :  { %1751 = vsyncpa [#allocation3 + $0x1], 1 }
 0xc24   :  { %1752 = vsyncpa [#allocation6], 1 }
 0xc25   :  { %1754 = vsyncpa [#allocation6 + $0x1], 1 }
 0xc26   :  { %1755 = vsyncpa [#allocation9], 1 }
 0xc27   :  { %1756 = vsyncpa [#allocation12], 1 }
 0xc28   :  { %1757 = vsyncpa [#allocation15], 1 }
 0xc29   :  { %1758 = vsyncpa [#allocation18], 1 }
 0xc2a   :  { %1759 = vsyncpa [#allocation21], 1 }
 0xc2b   :  { %1760 = vsyncpa [#allocation24], 1 }
 0xc2c   :  { %1761 = vsyncpa [#allocation27], 1 }
 0xc2d   :  { %1762 = vsyncpa [#allocation4], 1 }
 0xc2e   :  { %1764 = vsyncpa [#allocation4 + $0x1], 1 }

</bundles_post_ra>
